<compile_context>
chip_gen: v7x
topology: tpu7x:2x2x1
jax: 0.10.0
libtpu: 0.0.40
codegen_flags: <defaults>
</compile_context>

<pallas_src>
import functools

import jax
import jax.numpy as jnp
from jax import lax
from jax.experimental import pallas as pl
from jax.experimental.pallas import tpu as pltpu


# ----------------------------- helpers (in-kernel) ---------------------------
def _layernorm(x, g, b):
    mean = jnp.mean(x, axis=-1, keepdims=True)
    var = jnp.mean((x - mean) ** 2, axis=-1, keepdims=True)   # biased, like torch
    return (x - mean) * lax.rsqrt(var + 1e-5) * g + b


# -------------------- fused whole-encoder kernel (grid = (B, L)) -------------
def _encoder_kernel(x_ref, slopes_ref, ln1g_ref, ln1b_ref, wqkv_ref,
                    wo_ref, bo_ref, ln2g_ref, ln2b_ref,
                    w1_ref, b1_ref, w2_ref, b2_ref, wlin_ref, wcls_ref,
                    out_ref, *rest, num_heads, collect_attention):
    if collect_attention:
        att_ref, x_scr = rest
    else:
        (x_scr,) = rest
        att_ref = None

    layer = pl.program_id(1)
    n_layers = pl.num_programs(1)

    # Load this batch element's embeddings into the resident VMEM activation.
    @pl.when(layer == 0)
    def _():
        x_scr[...] = x_ref[...]

    x = x_scr[...]                                            # [T, E]
    T, E = x.shape
    H = num_heads
    D = E // H

    # --- LayerNorm 1 ---
    x_ln1 = _layernorm(x, ln1g_ref[...], ln1b_ref[...])

    # --- fused QKV projection (D**-0.5 already folded into the Q columns) ---
    qkv = jnp.dot(x_ln1, wqkv_ref[...],
                  preferred_element_type=jnp.float32)         # [T, 3E]
    q = jnp.swapaxes(qkv[:, 0 * E:1 * E].reshape(T, H, D), 0, 1)   # [H, T, D]
    k = jnp.swapaxes(qkv[:, 1 * E:2 * E].reshape(T, H, D), 0, 1)   # [H, T, D]
    v = jnp.swapaxes(qkv[:, 2 * E:3 * E].reshape(T, H, D), 0, 1)   # [H, T, D]

    # --- ALiBi bias generated on the fly: -|i-j| * slope_h (no HBM table) ---
    ti = lax.broadcasted_iota(jnp.int32, (T, T), 0)
    tj = lax.broadcasted_iota(jnp.int32, (T, T), 1)
    dist = -jnp.abs(ti - tj).astype(jnp.float32)              # [T, T]
    bias = slopes_ref[...][:, :, None] * dist[None, :, :]     # [H, T, T]

    # --- all heads in one batched einsum ---
    s = jnp.einsum('htd,hsd->hts', q, k,
                   preferred_element_type=jnp.float32) + bias  # [H, T, T]
    s = s - jnp.max(s, axis=-1, keepdims=True)                 # stable softmax
    e = jnp.exp(s)
    p = e * pl.reciprocal(jnp.sum(e, axis=-1, keepdims=True), approx=True)
    if att_ref is not None:
        att_ref[...] = p                                       # attention maps

    ctx = jnp.einsum('hts,hsd->htd', p, v,
                     preferred_element_type=jnp.float32)       # [H, T, D]
    ctx = jnp.swapaxes(ctx, 0, 1).reshape(T, E)                # concat heads

    mha = jnp.dot(ctx, wo_ref[...],
                  preferred_element_type=jnp.float32) + bo_ref[...]
    x1 = x + mha                                               # residual 1 (dropout = id)

    # --- LayerNorm 2 + FFN + residual 2 ---
    x_ln2 = _layernorm(x1, ln2g_ref[...], ln2b_ref[...])
    h1 = jnp.maximum(
        jnp.dot(x_ln2, w1_ref[...], preferred_element_type=jnp.float32)
        + b1_ref[...], 0.0)                                    # ReLU
    ff = jnp.dot(h1, w2_ref[...],
                 preferred_element_type=jnp.float32) + b2_ref[...]
    x_new = x1 + ff                                            # dropout = identity
    x_scr[...] = x_new                                         # stays resident in VMEM

    # --- classifier head fused into the final layer step ---
    @pl.when(layer == n_layers - 1)
    def _():
        pooled = jnp.mean(x_new, axis=0, keepdims=True)        # mean over time [1, E]
        hcls = jnp.maximum(
            jnp.dot(pooled, wlin_ref[...], preferred_element_type=jnp.float32), 0.0)
        out_ref[...] = jnp.dot(hcls, wcls_ref[...],
                               preferred_element_type=jnp.float32)   # [1, C]


# ------------------------------- Forward pass --------------------------------
def alibi_encoder_forward(params, tokens, collect_attention=True):
    # TODO(synk): embedding gather kept in plain JAX (jnp.take) instead of a
    #   fused PrefetchScalarGridSpec / pl.Element row-gather (low priority).
    x = jnp.take(params['embedding'], tokens, axis=0)          # [B, T, E]
    B, T, E = x.shape
    H = params['num_heads']
    L = params['wqkv'].shape[0]
    Ch = params['w_linear'].shape[1]
    C = params['w_classifier'].shape[1]

    def layer_spec(shape):     # stacked per-layer weight, indexed by layer axis
        return pl.BlockSpec((None,) + shape, lambda b, l: (l,) + (0,) * len(shape))

    def const_spec(shape):     # shared across the whole grid
        return pl.BlockSpec(shape, lambda b, l: (0,) * len(shape))

    in_specs = [
        pl.BlockSpec((None, T, E), lambda b, l: (b, 0, 0)),    # x (per batch element)
        const_spec((H, 1)),                                     # alibi slopes
        layer_spec((1, E)), layer_spec((1, E)),                 # ln1 g/b
        layer_spec((E, 3 * E)),                                 # wqkv
        layer_spec((E, E)), layer_spec((1, E)),                 # wo / bo
        layer_spec((1, E)), layer_spec((1, E)),                 # ln2 g/b
        layer_spec((E, 4 * E)), layer_spec((1, 4 * E)),         # w1 / b1
        layer_spec((4 * E, E)), layer_spec((1, E)),             # w2 / b2
        const_spec((E, Ch)),                                    # classifier linear
        const_spec((Ch, C)),                                    # classifier out
    ]

    out_shapes = [jax.ShapeDtypeStruct((B, 1, C), jnp.float32)]
    out_specs = [pl.BlockSpec((None, 1, C), lambda b, l: (b, 0, 0))]
    if collect_attention:
        out_shapes.append(jax.ShapeDtypeStruct((L, B, H, T, T), jnp.float32))
        out_specs.append(
            pl.BlockSpec((None, None, H, T, T), lambda b, l: (l, b, 0, 0, 0)))

    results = pl.pallas_call(
        functools.partial(_encoder_kernel, num_heads=H,
                          collect_attention=collect_attention),
        grid=(B, L),
        in_specs=in_specs,
        out_specs=tuple(out_specs),
        out_shape=tuple(out_shapes),
        scratch_shapes=[pltpu.VMEM((T, E), jnp.float32)],       # resident activation
        compiler_params=pltpu.CompilerParams(
            dimension_semantics=("parallel", "arbitrary")),
    )(x, params['slopes'], params['ln1_g'], params['ln1_b'], params['wqkv'],
      params['wo'], params['bo'], params['ln2_g'], params['ln2_b'],
      params['w1'], params['b1'], params['w2'], params['b2'],
      params['w_linear'], params['w_classifier'])

    if collect_attention:
        logits, att = results
        attention_maps = [att[i] for i in range(L)]             # each [B, H, T, T]
    else:
        (logits,) = results
        attention_maps = []
    return logits[:, 0, :], attention_maps                      # [B, C]


# ----------------------------- Parameter setup -------------------------------
def init_params(key, vocab_size, E, num_layers, num_heads, block_size,
                classifier_hidden_dim, classifier_dim):
    del block_size  # ALiBi distance matrix is generated in-kernel.
    D = E // num_heads
    L = num_layers
    scale = 0.02
    k_emb, k_lin, k_cls, k_layers = jax.random.split(key, 4)

    params = {
        'embedding': jax.random.normal(k_emb, (vocab_size, E), jnp.float32) * scale,
        'w_linear': jax.random.normal(k_lin, (E, classifier_hidden_dim),
                                      jnp.float32) * scale,          # bias=False
        'w_classifier': jax.random.normal(k_cls, (classifier_hidden_dim,
                                                  classifier_dim),
                                          jnp.float32) * scale,       # bias=False
        'num_heads': num_heads,
    }

    # per-head ALiBi slopes: slope_h = (2^(-8/H))^(h+1); -|i-j| built in-kernel.
    slope_base = 2.0 ** (-8.0 / num_heads)
    params['slopes'] = (slope_base
                        ** jnp.arange(1, num_heads + 1, dtype=jnp.float32)
                        ).reshape(num_heads, 1)

    lk = jax.random.split(k_layers, 6)
    # Per-head Q/K/V weights [L,H,E,D] packed head-major into one [L, E, 3E]
    # QKV weight (matches torch's concat-of-heads ordering).  The attention
    # scale D**-0.5 is folded into the Q columns.
    wq = jax.random.normal(lk[0], (L, num_heads, E, D), jnp.float32) * scale
    wk = jax.random.normal(lk[1], (L, num_heads, E, D), jnp.float32) * scale
    wv = jax.random.normal(lk[2], (L, num_heads, E, D), jnp.float32) * scale
    wq = wq * (D ** -0.5)

    def pack(w):  # [L,H,E,D] -> [L, E, H*D], column = h*D + d
        return jnp.transpose(w, (0, 2, 1, 3)).reshape(L, E, num_heads * D)

    params['wqkv'] = jnp.concatenate([pack(wq), pack(wk), pack(wv)], axis=-1)
    params['ln1_g'] = jnp.ones((L, 1, E), jnp.float32)
    params['ln1_b'] = jnp.zeros((L, 1, E), jnp.float32)
    params['wo'] = jax.random.normal(lk[3], (L, E, E), jnp.float32) * scale
    params['bo'] = jnp.zeros((L, 1, E), jnp.float32)
    params['ln2_g'] = jnp.ones((L, 1, E), jnp.float32)
    params['ln2_b'] = jnp.zeros((L, 1, E), jnp.float32)
    params['w1'] = jax.random.normal(lk[4], (L, E, 4 * E), jnp.float32) * scale
    params['b1'] = jnp.zeros((L, 1, 4 * E), jnp.float32)
    params['w2'] = jax.random.normal(lk[5], (L, 4 * E, E), jnp.float32) * scale
    params['b2'] = jnp.zeros((L, 1, E), jnp.float32)
    return params


# ----------------------------------- main -------------------------------------
if __name__ == "__main__":
    vocab_size = 50
    embedding_size = 32
    num_layers = 2
    block_size = 8          # sequence length T
    num_heads = 4
    classifier_hidden_dim = 16
    classifier_dim = 4
    batch = 2

    key = jax.random.PRNGKey(0)
    pkey, tkey = jax.random.split(key)

    params = init_params(pkey, vocab_size, embedding_size, num_layers,
                         num_heads, block_size, classifier_hidden_dim,
                         classifier_dim)
    tokens = jax.random.randint(tkey, (batch, block_size), 0, vocab_size,
                                dtype=jnp.int32)

    out, attention_maps = alibi_encoder_forward(params, tokens)
    jax.block_until_ready(out)
    for a in attention_maps:
        jax.block_until_ready(a)

    assert out.shape == (batch, classifier_dim)
    assert len(attention_maps) == num_layers
    assert all(a.shape == (batch, num_heads, block_size, block_size)
               for a in attention_maps)
    print("KERNEL_OK")
</pallas_src>

<mosaic_0001>
module attributes {stable_mosaic.version = 11 : i64} {
  func.func @_encoder_kernel(%arg0: i32, %arg1: i32, %arg2: memref<1x8x32xf32, #tpu.memory_space<vmem>>, %arg3: memref<4x1xf32, #tpu.memory_space<vmem>>, %arg4: memref<1x1x32xf32, #tpu.memory_space<vmem>>, %arg5: memref<1x1x32xf32, #tpu.memory_space<vmem>>, %arg6: memref<1x32x96xf32, #tpu.memory_space<vmem>>, %arg7: memref<1x32x32xf32, #tpu.memory_space<vmem>>, %arg8: memref<1x1x32xf32, #tpu.memory_space<vmem>>, %arg9: memref<1x1x32xf32, #tpu.memory_space<vmem>>, %arg10: memref<1x1x32xf32, #tpu.memory_space<vmem>>, %arg11: memref<1x32x128xf32, #tpu.memory_space<vmem>>, %arg12: memref<1x1x128xf32, #tpu.memory_space<vmem>>, %arg13: memref<1x128x32xf32, #tpu.memory_space<vmem>>, %arg14: memref<1x1x32xf32, #tpu.memory_space<vmem>>, %arg15: memref<32x16xf32, #tpu.memory_space<vmem>>, %arg16: memref<16x4xf32, #tpu.memory_space<vmem>>, %arg17: memref<1x1x4xf32, #tpu.memory_space<vmem>>, %arg18: memref<1x1x4x8x8xf32, #tpu.memory_space<vmem>>, %arg19: memref<8x32xf32, #tpu.memory_space<vmem>>) attributes {dimension_semantics = [#tpu.dimension_semantics<parallel>, #tpu.dimension_semantics<arbitrary>], iteration_bounds = array<i64: 2, 2>, scalar_prefetch = 0 : i64, scratch_operands = 1 : i64, tpu.core_type = #tpu.core_type<tc>, window_params = [{transform_indices = @transform_0, window_bounds = array<i64: 1, 8, 32>}, {pipeline_mode = #tpu.pipeline_mode<synchronous>, transform_indices = @transform_1, window_bounds = array<i64: 4, 1>}, {transform_indices = @transform_2, window_bounds = array<i64: 1, 1, 32>}, {transform_indices = @transform_3, window_bounds = array<i64: 1, 1, 32>}, {transform_indices = @transform_4, window_bounds = array<i64: 1, 32, 96>}, {transform_indices = @transform_5, window_bounds = array<i64: 1, 32, 32>}, {transform_indices = @transform_6, window_bounds = array<i64: 1, 1, 32>}, {transform_indices = @transform_7, window_bounds = array<i64: 1, 1, 32>}, {transform_indices = @transform_8, window_bounds = array<i64: 1, 1, 32>}, {transform_indices = @transform_9, window_bounds = array<i64: 1, 32, 128>}, {transform_indices = @transform_10, window_bounds = array<i64: 1, 1, 128>}, {transform_indices = @transform_11, window_bounds = array<i64: 1, 128, 32>}, {transform_indices = @transform_12, window_bounds = array<i64: 1, 1, 32>}, {pipeline_mode = #tpu.pipeline_mode<synchronous>, transform_indices = @transform_13, window_bounds = array<i64: 32, 16>}, {pipeline_mode = #tpu.pipeline_mode<synchronous>, transform_indices = @transform_14, window_bounds = array<i64: 16, 4>}, {transform_indices = @transform_15, window_bounds = array<i64: 1, 1, 4>}, {transform_indices = @transform_16, window_bounds = array<i64: 1, 1, 4, 8, 8>}]} {
    %c0_i32 = arith.constant 0 : i32
    %0 = arith.cmpi eq, %arg1, %c0_i32 : i32
    %1 = arith.extui %0 : i1 to i32
    %c0_i32_0 = arith.constant 0 : i32
    %2 = arith.cmpi ne, %1, %c0_i32_0 : i32
    scf.if %2 {
      %c0_64 = arith.constant 0 : index
      %c0_65 = arith.constant 0 : index
      %c0_66 = arith.constant 0 : index
      %128 = vector.load %arg2[%c0_64, %c0_65, %c0_66] : memref<1x8x32xf32, #tpu.memory_space<vmem>>, vector<1x8x32xf32>
      %129 = vector.shape_cast %128 : vector<1x8x32xf32> to vector<8x32xf32>
      %c0_67 = arith.constant 0 : index
      %c0_68 = arith.constant 0 : index
      %130 = vector.load %arg19[%c0_67, %c0_68] : memref<8x32xf32, #tpu.memory_space<vmem>>, vector<8x32xf32>
      tpu.vector_store %arg19[%c0_67, %c0_68], %129 {strides = array<i32>} : memref<8x32xf32, #tpu.memory_space<vmem>>, vector<8x32xf32>,
    } else {
    }
    %c0 = arith.constant 0 : index
    %c0_1 = arith.constant 0 : index
    %3 = vector.load %arg19[%c0, %c0_1] : memref<8x32xf32, #tpu.memory_space<vmem>>, vector<8x32xf32>
    %c0_2 = arith.constant 0 : index
    %c0_3 = arith.constant 0 : index
    %c0_4 = arith.constant 0 : index
    %4 = vector.load %arg4[%c0_2, %c0_3, %c0_4] : memref<1x1x32xf32, #tpu.memory_space<vmem>>, vector<1x1x32xf32>
    %5 = vector.shape_cast %4 : vector<1x1x32xf32> to vector<1x32xf32>
    %c0_5 = arith.constant 0 : index
    %c0_6 = arith.constant 0 : index
    %c0_7 = arith.constant 0 : index
    %6 = vector.load %arg5[%c0_5, %c0_6, %c0_7] : memref<1x1x32xf32, #tpu.memory_space<vmem>>, vector<1x1x32xf32>
    %7 = vector.shape_cast %6 : vector<1x1x32xf32> to vector<1x32xf32>
    %cst = arith.constant dense<0.000000e+00> : vector<8xf32>
    %8 = vector.multi_reduction <add>, %3, %cst [1] : vector<8x32xf32> to vector<8xf32>
    %9 = vector.shape_cast %8 : vector<8xf32> to vector<8x1xf32>
    %cst_8 = arith.constant 3.200000e+01 : f32
    %10 = vector.broadcast %cst_8 : f32 to vector<8x1xf32>
    %11 = arith.divf %9, %10 : vector<8x1xf32>
    %12 = vector.broadcast %11 : vector<8x1xf32> to vector<8x32xf32>
    %13 = arith.subf %3, %12 : vector<8x32xf32>
    %14 = arith.mulf %13, %13 : vector<8x32xf32>
    %cst_9 = arith.constant dense<0.000000e+00> : vector<8xf32>
    %15 = vector.multi_reduction <add>, %14, %cst_9 [1] : vector<8x32xf32> to vector<8xf32>
    %16 = vector.shape_cast %15 : vector<8xf32> to vector<8x1xf32>
    %cst_10 = arith.constant 3.200000e+01 : f32
    %17 = vector.broadcast %cst_10 : f32 to vector<8x1xf32>
    %18 = arith.divf %16, %17 : vector<8x1xf32>
    %19 = vector.broadcast %11 : vector<8x1xf32> to vector<8x32xf32>
    %20 = arith.subf %3, %19 : vector<8x32xf32>
    %cst_11 = arith.constant 9.99999974E-6 : f32
    %21 = vector.broadcast %cst_11 : f32 to vector<8x1xf32>
    %22 = arith.addf %18, %21 : vector<8x1xf32>
    %23 = math.rsqrt %22 : vector<8x1xf32>
    %24 = vector.broadcast %23 : vector<8x1xf32> to vector<8x32xf32>
    %25 = arith.mulf %20, %24 : vector<8x32xf32>
    %26 = vector.broadcast %5 : vector<1x32xf32> to vector<8x32xf32>
    %27 = arith.mulf %25, %26 : vector<8x32xf32>
    %28 = vector.broadcast %7 : vector<1x32xf32> to vector<8x32xf32>
    %29 = arith.addf %27, %28 : vector<8x32xf32>
    %c0_12 = arith.constant 0 : index
    %c0_13 = arith.constant 0 : index
    %c0_14 = arith.constant 0 : index
    %30 = vector.load %arg6[%c0_12, %c0_13, %c0_14] : memref<1x32x96xf32, #tpu.memory_space<vmem>>, vector<1x32x96xf32>
    %31 = vector.shape_cast %30 : vector<1x32x96xf32> to vector<32x96xf32>
    %cst_15 = arith.constant dense<0.000000e+00> : vector<8x96xf32>
    %32 = tpu.matmul %29, %31, %cst_15 {dimension_numbers = #tpu.dot_dimension_numbers<[1], [0], [0], [1], [0, 0, 1, 1], [], []>} : vector<8x32xf32>, vector<32x96xf32>, vector<8x96xf32> -> vector<8x96xf32>
    %33 = vector.extract_strided_slice %32 {offsets = [0, 0], sizes = [8, 32], strides = [1, 1]} : vector<8x96xf32> to vector<8x32xf32>
    %34 = vector.shape_cast %33 : vector<8x32xf32> to vector<8x4x8xf32>
    %35 = tpu.transpose %34, [1, 0, 2] : vector<8x4x8xf32> -> vector<4x8x8xf32>
    %36 = vector.extract_strided_slice %32 {offsets = [0, 32], sizes = [8, 32], strides = [1, 1]} : vector<8x96xf32> to vector<8x32xf32>
    %37 = vector.shape_cast %36 : vector<8x32xf32> to vector<8x4x8xf32>
    %38 = tpu.transpose %37, [1, 0, 2] : vector<8x4x8xf32> -> vector<4x8x8xf32>
    %39 = vector.extract_strided_slice %32 {offsets = [0, 64], sizes = [8, 32], strides = [1, 1]} : vector<8x96xf32> to vector<8x32xf32>
    %40 = vector.shape_cast %39 : vector<8x32xf32> to vector<8x4x8xf32>
    %41 = tpu.transpose %40, [1, 0, 2] : vector<8x4x8xf32> -> vector<4x8x8xf32>
    %42 = tpu.iota {dimensions = array<i32: 0>} : vector<8x8xi32>
    %43 = tpu.iota {dimensions = array<i32: 1>} : vector<8x8xi32>
    %44 = arith.subi %42, %43 : vector<8x8xi32>
    %45 = math.absi %44 : vector<8x8xi32>
    %46 = arith.sitofp %45 : vector<8x8xi32> to vector<8x8xf32>
    %cst_16 = arith.constant 0.000000e+00 : f32
    %47 = vector.broadcast %cst_16 : f32 to vector<8x8xf32>
    %48 = arith.subf %47, %46 : vector<8x8xf32>
    %c0_17 = arith.constant 0 : index
    %c0_18 = arith.constant 0 : index
    %49 = vector.load %arg3[%c0_17, %c0_18] : memref<4x1xf32, #tpu.memory_space<vmem>>, vector<4x1xf32>
    %50 = vector.shape_cast %49 : vector<4x1xf32> to vector<4x1x1xf32>
    %51 = vector.shape_cast %48 : vector<8x8xf32> to vector<1x8x8xf32>
    %52 = vector.broadcast %50 : vector<4x1x1xf32> to vector<4x8x8xf32>
    %53 = vector.broadcast %51 : vector<1x8x8xf32> to vector<4x8x8xf32>
    %54 = arith.mulf %52, %53 : vector<4x8x8xf32>
    "tpu.trace_start"() <{level = 10 : i32, message = "htd,hsd->hts"}> : () -> ()
    %cst_19 = arith.constant dense<0.000000e+00> : vector<4x8x8xf32>
    %55 = tpu.matmul %35, %38, %cst_19 {dimension_numbers = #tpu.dot_dimension_numbers<[2], [2], [1], [1], [0, 0, 0, 1, 1, 1], [0], [0]>} : vector<4x8x8xf32>, vector<4x8x8xf32>, vector<4x8x8xf32> -> vector<4x8x8xf32>
    "tpu.trace_stop"() : () -> ()
    %56 = arith.addf %55, %54 : vector<4x8x8xf32>
    %cst_20 = arith.constant dense<0xFF800000> : vector<4x8xf32>
    %57 = vector.multi_reduction <maximumf>, %56, %cst_20 [2] : vector<4x8x8xf32> to vector<4x8xf32>
    %58 = vector.shape_cast %57 : vector<4x8xf32> to vector<4x8x1xf32>
    %59 = vector.broadcast %58 : vector<4x8x1xf32> to vector<4x8x8xf32>
    %60 = arith.subf %56, %59 : vector<4x8x8xf32>
    %61 = math.exp %60 : vector<4x8x8xf32>
    %cst_21 = arith.constant dense<0.000000e+00> : vector<4x8xf32>
    %62 = vector.multi_reduction <add>, %61, %cst_21 [2] : vector<4x8x8xf32> to vector<4x8xf32>
    %63 = vector.shape_cast %62 : vector<4x8xf32> to vector<4x8x1xf32>
    %64 = tpu.reciprocal %63 {approx = true} : vector<4x8x1xf32> -> vector<4x8x1xf32>
    %65 = vector.broadcast %64 : vector<4x8x1xf32> to vector<4x8x8xf32>
    %66 = arith.mulf %61, %65 : vector<4x8x8xf32>
    %c0_22 = arith.constant 0 : index
    %c0_23 = arith.constant 0 : index
    %c0_24 = arith.constant 0 : index
    %c0_25 = arith.constant 0 : index
    %c0_26 = arith.constant 0 : index
    %67 = vector.load %arg18[%c0_22, %c0_23, %c0_24, %c0_25, %c0_26] : memref<1x1x4x8x8xf32, #tpu.memory_space<vmem>>, vector<1x1x4x8x8xf32>
    %68 = vector.shape_cast %67 : vector<1x1x4x8x8xf32> to vector<4x8x8xf32>
    %69 = vector.shape_cast %66 : vector<4x8x8xf32> to vector<1x1x4x8x8xf32>
    tpu.vector_store %arg18[%c0_22, %c0_23, %c0_24, %c0_25, %c0_26], %69 {strides = array<i32>} : memref<1x1x4x8x8xf32, #tpu.memory_space<vmem>>, vector<1x1x4x8x8xf32>,
    "tpu.trace_start"() <{level = 10 : i32, message = "hts,hsd->htd"}> : () -> ()
    %cst_27 = arith.constant dense<0.000000e+00> : vector<4x8x8xf32>
    %70 = tpu.matmul %66, %41, %cst_27 {dimension_numbers = #tpu.dot_dimension_numbers<[2], [1], [1], [2], [0, 0, 0, 1, 1, 2], [0], [0]>} : vector<4x8x8xf32>, vector<4x8x8xf32>, vector<4x8x8xf32> -> vector<4x8x8xf32>
    "tpu.trace_stop"() : () -> ()
    %71 = tpu.transpose %70, [1, 0, 2] : vector<4x8x8xf32> -> vector<8x4x8xf32>
    %72 = vector.shape_cast %71 : vector<8x4x8xf32> to vector<8x32xf32>
    %c0_28 = arith.constant 0 : index
    %c0_29 = arith.constant 0 : index
    %c0_30 = arith.constant 0 : index
    %73 = vector.load %arg7[%c0_28, %c0_29, %c0_30] : memref<1x32x32xf32, #tpu.memory_space<vmem>>, vector<1x32x32xf32>
    %74 = vector.shape_cast %73 : vector<1x32x32xf32> to vector<32x32xf32>
    %cst_31 = arith.constant dense<0.000000e+00> : vector<8x32xf32>
    %75 = tpu.matmul %72, %74, %cst_31 {dimension_numbers = #tpu.dot_dimension_numbers<[1], [0], [0], [1], [0, 0, 1, 1], [], []>} : vector<8x32xf32>, vector<32x32xf32>, vector<8x32xf32> -> vector<8x32xf32>
    %c0_32 = arith.constant 0 : index
    %c0_33 = arith.constant 0 : index
    %c0_34 = arith.constant 0 : index
    %76 = vector.load %arg8[%c0_32, %c0_33, %c0_34] : memref<1x1x32xf32, #tpu.memory_space<vmem>>, vector<1x1x32xf32>
    %77 = vector.shape_cast %76 : vector<1x1x32xf32> to vector<1x32xf32>
    %78 = vector.broadcast %77 : vector<1x32xf32> to vector<8x32xf32>
    %79 = arith.addf %75, %78 : vector<8x32xf32>
    %80 = arith.addf %3, %79 : vector<8x32xf32>
    %c0_35 = arith.constant 0 : index
    %c0_36 = arith.constant 0 : index
    %c0_37 = arith.constant 0 : index
    %81 = vector.load %arg9[%c0_35, %c0_36, %c0_37] : memref<1x1x32xf32, #tpu.memory_space<vmem>>, vector<1x1x32xf32>
    %82 = vector.shape_cast %81 : vector<1x1x32xf32> to vector<1x32xf32>
    %c0_38 = arith.constant 0 : index
    %c0_39 = arith.constant 0 : index
    %c0_40 = arith.constant 0 : index
    %83 = vector.load %arg10[%c0_38, %c0_39, %c0_40] : memref<1x1x32xf32, #tpu.memory_space<vmem>>, vector<1x1x32xf32>
    %84 = vector.shape_cast %83 : vector<1x1x32xf32> to vector<1x32xf32>
    %cst_41 = arith.constant dense<0.000000e+00> : vector<8xf32>
    %85 = vector.multi_reduction <add>, %80, %cst_41 [1] : vector<8x32xf32> to vector<8xf32>
    %86 = vector.shape_cast %85 : vector<8xf32> to vector<8x1xf32>
    %cst_42 = arith.constant 3.200000e+01 : f32
    %87 = vector.broadcast %cst_42 : f32 to vector<8x1xf32>
    %88 = arith.divf %86, %87 : vector<8x1xf32>
    %89 = vector.broadcast %88 : vector<8x1xf32> to vector<8x32xf32>
    %90 = arith.subf %80, %89 : vector<8x32xf32>
    %91 = arith.mulf %90, %90 : vector<8x32xf32>
    %cst_43 = arith.constant dense<0.000000e+00> : vector<8xf32>
    %92 = vector.multi_reduction <add>, %91, %cst_43 [1] : vector<8x32xf32> to vector<8xf32>
    %93 = vector.shape_cast %92 : vector<8xf32> to vector<8x1xf32>
    %cst_44 = arith.constant 3.200000e+01 : f32
    %94 = vector.broadcast %cst_44 : f32 to vector<8x1xf32>
    %95 = arith.divf %93, %94 : vector<8x1xf32>
    %96 = vector.broadcast %88 : vector<8x1xf32> to vector<8x32xf32>
    %97 = arith.subf %80, %96 : vector<8x32xf32>
    %cst_45 = arith.constant 9.99999974E-6 : f32
    %98 = vector.broadcast %cst_45 : f32 to vector<8x1xf32>
    %99 = arith.addf %95, %98 : vector<8x1xf32>
    %100 = math.rsqrt %99 : vector<8x1xf32>
    %101 = vector.broadcast %100 : vector<8x1xf32> to vector<8x32xf32>
    %102 = arith.mulf %97, %101 : vector<8x32xf32>
    %103 = vector.broadcast %82 : vector<1x32xf32> to vector<8x32xf32>
    %104 = arith.mulf %102, %103 : vector<8x32xf32>
    %105 = vector.broadcast %84 : vector<1x32xf32> to vector<8x32xf32>
    %106 = arith.addf %104, %105 : vector<8x32xf32>
    %c0_46 = arith.constant 0 : index
    %c0_47 = arith.constant 0 : index
    %c0_48 = arith.constant 0 : index
    %107 = vector.load %arg11[%c0_46, %c0_47, %c0_48] : memref<1x32x128xf32, #tpu.memory_space<vmem>>, vector<1x32x128xf32>
    %108 = vector.shape_cast %107 : vector<1x32x128xf32> to vector<32x128xf32>
    %cst_49 = arith.constant dense<0.000000e+00> : vector<8x128xf32>
    %109 = tpu.matmul %106, %108, %cst_49 {dimension_numbers = #tpu.dot_dimension_numbers<[1], [0], [0], [1], [0, 0, 1, 1], [], []>} : vector<8x32xf32>, vector<32x128xf32>, vector<8x128xf32> -> vector<8x128xf32>
    %c0_50 = arith.constant 0 : index
    %c0_51 = arith.constant 0 : index
    %c0_52 = arith.constant 0 : index
    %110 = vector.load %arg12[%c0_50, %c0_51, %c0_52] : memref<1x1x128xf32, #tpu.memory_space<vmem>>, vector<1x1x128xf32>
    %111 = vector.shape_cast %110 : vector<1x1x128xf32> to vector<1x128xf32>
    %112 = vector.broadcast %111 : vector<1x128xf32> to vector<8x128xf32>
    %113 = arith.addf %109, %112 : vector<8x128xf32>
    %cst_53 = arith.constant 0.000000e+00 : f32
    %114 = vector.broadcast %cst_53 : f32 to vector<8x128xf32>
    %115 = arith.maximumf %113, %114 : vector<8x128xf32>
    %c0_54 = arith.constant 0 : index
    %c0_55 = arith.constant 0 : index
    %c0_56 = arith.constant 0 : index
    %116 = vector.load %arg13[%c0_54, %c0_55, %c0_56] : memref<1x128x32xf32, #tpu.memory_space<vmem>>, vector<1x128x32xf32>
    %117 = vector.shape_cast %116 : vector<1x128x32xf32> to vector<128x32xf32>
    %cst_57 = arith.constant dense<0.000000e+00> : vector<8x32xf32>
    %118 = tpu.matmul %115, %117, %cst_57 {dimension_numbers = #tpu.dot_dimension_numbers<[1], [0], [0], [1], [0, 0, 1, 1], [], []>} : vector<8x128xf32>, vector<128x32xf32>, vector<8x32xf32> -> vector<8x32xf32>
    %c0_58 = arith.constant 0 : index
    %c0_59 = arith.constant 0 : index
    %c0_60 = arith.constant 0 : index
    %119 = vector.load %arg14[%c0_58, %c0_59, %c0_60] : memref<1x1x32xf32, #tpu.memory_space<vmem>>, vector<1x1x32xf32>
    %120 = vector.shape_cast %119 : vector<1x1x32xf32> to vector<1x32xf32>
    %121 = vector.broadcast %120 : vector<1x32xf32> to vector<8x32xf32>
    %122 = arith.addf %118, %121 : vector<8x32xf32>
    %123 = arith.addf %80, %122 : vector<8x32xf32>
    %c0_61 = arith.constant 0 : index
    %c0_62 = arith.constant 0 : index
    %124 = vector.load %arg19[%c0_61, %c0_62] : memref<8x32xf32, #tpu.memory_space<vmem>>, vector<8x32xf32>
    tpu.vector_store %arg19[%c0_61, %c0_62], %123 {strides = array<i32>} : memref<8x32xf32, #tpu.memory_space<vmem>>, vector<8x32xf32>,
    %c1_i32 = arith.constant 1 : i32
    %125 = arith.cmpi eq, %arg1, %c1_i32 : i32
    %126 = arith.extui %125 : i1 to i32
    %c0_i32_63 = arith.constant 0 : i32
    %127 = arith.cmpi ne, %126, %c0_i32_63 : i32
    scf.if %127 {
      %cst_64 = arith.constant dense<0.000000e+00> : vector<32xf32>
      %128 = vector.multi_reduction <add>, %123, %cst_64 [0] : vector<8x32xf32> to vector<32xf32>
      %129 = vector.shape_cast %128 : vector<32xf32> to vector<1x32xf32>
      %cst_65 = arith.constant 8.000000e+00 : f32
      %130 = vector.broadcast %cst_65 : f32 to vector<1x32xf32>
      %131 = arith.divf %129, %130 : vector<1x32xf32>
      %c0_66 = arith.constant 0 : index
      %c0_67 = arith.constant 0 : index
      %132 = vector.load %arg15[%c0_66, %c0_67] : memref<32x16xf32, #tpu.memory_space<vmem>>, vector<32x16xf32>
      %cst_68 = arith.constant dense<0.000000e+00> : vector<1x16xf32>
      %133 = tpu.matmul %131, %132, %cst_68 {dimension_numbers = #tpu.dot_dimension_numbers<[1], [0], [0], [1], [0, 0, 1, 1], [], []>} : vector<1x32xf32>, vector<32x16xf32>, vector<1x16xf32> -> vector<1x16xf32>
      %cst_69 = arith.constant 0.000000e+00 : f32
      %134 = vector.broadcast %cst_69 : f32 to vector<1x16xf32>
      %135 = arith.maximumf %133, %134 : vector<1x16xf32>
      %c0_70 = arith.constant 0 : index
      %c0_71 = arith.constant 0 : index
      %136 = vector.load %arg16[%c0_70, %c0_71] : memref<16x4xf32, #tpu.memory_space<vmem>>, vector<16x4xf32>
      %cst_72 = arith.constant dense<0.000000e+00> : vector<1x4xf32>
      %137 = tpu.matmul %135, %136, %cst_72 {dimension_numbers = #tpu.dot_dimension_numbers<[1], [0], [0], [1], [0, 0, 1, 1], [], []>} : vector<1x16xf32>, vector<16x4xf32>, vector<1x4xf32> -> vector<1x4xf32>
      %c0_73 = arith.constant 0 : index
      %c0_74 = arith.constant 0 : index
      %c0_75 = arith.constant 0 : index
      %138 = vector.load %arg17[%c0_73, %c0_74, %c0_75] : memref<1x1x4xf32, #tpu.memory_space<vmem>>, vector<1x1x4xf32>
      %139 = vector.shape_cast %138 : vector<1x1x4xf32> to vector<1x4xf32>
      %140 = vector.shape_cast %137 : vector<1x4xf32> to vector<1x1x4xf32>
      tpu.vector_store %arg17[%c0_73, %c0_74, %c0_75], %140 {strides = array<i32>} : memref<1x1x4xf32, #tpu.memory_space<vmem>>, vector<1x1x4xf32>,
    } else {
    }
    return
  }
  func.func @transform_0(%arg0: i32, %arg1: i32) -> (i32, i32, i32) {
    %c0_i32 = arith.constant 0 : i32
    %c0_i32_0 = arith.constant 0 : i32
    %c0_i32_1 = arith.constant 0 : i32
    return %arg0, %c0_i32, %c0_i32_0 : i32, i32, i32
  }
  func.func @transform_1(%arg0: i32, %arg1: i32) -> (i32, i32) {
    %c0_i32 = arith.constant 0 : i32
    %c0_i32_0 = arith.constant 0 : i32
    %c0_i32_1 = arith.constant 0 : i32
    return %c0_i32, %c0_i32_0 : i32, i32
  }
  func.func @transform_2(%arg0: i32, %arg1: i32) -> (i32, i32, i32) {
    %c0_i32 = arith.constant 0 : i32
    %c0_i32_0 = arith.constant 0 : i32
    %c0_i32_1 = arith.constant 0 : i32
    return %arg1, %c0_i32, %c0_i32_0 : i32, i32, i32
  }
  func.func @transform_3(%arg0: i32, %arg1: i32) -> (i32, i32, i32) {
    %c0_i32 = arith.constant 0 : i32
    %c0_i32_0 = arith.constant 0 : i32
    %c0_i32_1 = arith.constant 0 : i32
    return %arg1, %c0_i32, %c0_i32_0 : i32, i32, i32
  }
  func.func @transform_4(%arg0: i32, %arg1: i32) -> (i32, i32, i32) {
    %c0_i32 = arith.constant 0 : i32
    %c0_i32_0 = arith.constant 0 : i32
    %c0_i32_1 = arith.constant 0 : i32
    return %arg1, %c0_i32, %c0_i32_0 : i32, i32, i32
  }
  func.func @transform_5(%arg0: i32, %arg1: i32) -> (i32, i32, i32) {
    %c0_i32 = arith.constant 0 : i32
    %c0_i32_0 = arith.constant 0 : i32
    %c0_i32_1 = arith.constant 0 : i32
    return %arg1, %c0_i32, %c0_i32_0 : i32, i32, i32
  }
  func.func @transform_6(%arg0: i32, %arg1: i32) -> (i32, i32, i32) {
    %c0_i32 = arith.constant 0 : i32
    %c0_i32_0 = arith.constant 0 : i32
    %c0_i32_1 = arith.constant 0 : i32
    return %arg1, %c0_i32, %c0_i32_0 : i32, i32, i32
  }
  func.func @transform_7(%arg0: i32, %arg1: i32) -> (i32, i32, i32) {
    %c0_i32 = arith.constant 0 : i32
    %c0_i32_0 = arith.constant 0 : i32
    %c0_i32_1 = arith.constant 0 : i32
    return %arg1, %c0_i32, %c0_i32_0 : i32, i32, i32
  }
  func.func @transform_8(%arg0: i32, %arg1: i32) -> (i32, i32, i32) {
    %c0_i32 = arith.constant 0 : i32
    %c0_i32_0 = arith.constant 0 : i32
    %c0_i32_1 = arith.constant 0 : i32
    return %arg1, %c0_i32, %c0_i32_0 : i32, i32, i32
  }
  func.func @transform_9(%arg0: i32, %arg1: i32) -> (i32, i32, i32) {
    %c0_i32 = arith.constant 0 : i32
    %c0_i32_0 = arith.constant 0 : i32
    %c0_i32_1 = arith.constant 0 : i32
    return %arg1, %c0_i32, %c0_i32_0 : i32, i32, i32
  }
  func.func @transform_10(%arg0: i32, %arg1: i32) -> (i32, i32, i32) {
    %c0_i32 = arith.constant 0 : i32
    %c0_i32_0 = arith.constant 0 : i32
    %c0_i32_1 = arith.constant 0 : i32
    return %arg1, %c0_i32, %c0_i32_0 : i32, i32, i32
  }
  func.func @transform_11(%arg0: i32, %arg1: i32) -> (i32, i32, i32) {
    %c0_i32 = arith.constant 0 : i32
    %c0_i32_0 = arith.constant 0 : i32
    %c0_i32_1 = arith.constant 0 : i32
    return %arg1, %c0_i32, %c0_i32_0 : i32, i32, i32
  }
  func.func @transform_12(%arg0: i32, %arg1: i32) -> (i32, i32, i32) {
    %c0_i32 = arith.constant 0 : i32
    %c0_i32_0 = arith.constant 0 : i32
    %c0_i32_1 = arith.constant 0 : i32
    return %arg1, %c0_i32, %c0_i32_0 : i32, i32, i32
  }
  func.func @transform_13(%arg0: i32, %arg1: i32) -> (i32, i32) {
    %c0_i32 = arith.constant 0 : i32
    %c0_i32_0 = arith.constant 0 : i32
    %c0_i32_1 = arith.constant 0 : i32
    return %c0_i32, %c0_i32_0 : i32, i32
  }
  func.func @transform_14(%arg0: i32, %arg1: i32) -> (i32, i32) {
    %c0_i32 = arith.constant 0 : i32
    %c0_i32_0 = arith.constant 0 : i32
    %c0_i32_1 = arith.constant 0 : i32
    return %c0_i32, %c0_i32_0 : i32, i32
  }
  func.func @transform_15(%arg0: i32, %arg1: i32) -> (i32, i32, i32) {
    %c0_i32 = arith.constant 0 : i32
    %c0_i32_0 = arith.constant 0 : i32
    %c0_i32_1 = arith.constant 0 : i32
    return %arg0, %c0_i32, %c0_i32_0 : i32, i32, i32
  }
  func.func @transform_16(%arg0: i32, %arg1: i32) -> (i32, i32, i32, i32, i32) {
    %c0_i32 = arith.constant 0 : i32
    %c0_i32_0 = arith.constant 0 : i32
    %c0_i32_1 = arith.constant 0 : i32
    %c0_i32_2 = arith.constant 0 : i32
    return %arg1, %arg0, %c0_i32, %c0_i32_0, %c0_i32_1 : i32, i32, i32, i32, i32
  }
}

</mosaic_0001>

<bundles_post_ra>
// kernel: tpu_custom_call.1
= control target key start
LH: loop header
LB: loop body
LE: loop exit
PB: predicated region body
PF: predicated region fallthrough
CT: control target
= control target key end

     0   :  { %s4134_s0 = inlined_call_operand.vmem [shape: f32[2,8,32], index: 0, kind: input, shape index: {}]   ;;  %s4135_s1 = inlined_call_operand.vmem [shape: f32[4,1], index: 1, kind: input, shape index: {}]   ;;  %s4136_s2 = inlined_call_operand.vmem [shape: f32[2,1,32], index: 2, kind: input, shape index: {}]   ;;  %s4137_s3 = inlined_call_operand.vmem [shape: f32[2,1,32], index: 3, kind: input, shape index: {}]   ;;  %s4138_s4 = inlined_call_operand.vmem [shape: f32[2,32,96], index: 4, kind: input, shape index: {}]   ;;  %s4139_s5 = inlined_call_operand.vmem [shape: f32[2,32,32], index: 5, kind: input, shape index: {}]   ;;  %s4140_s6 = inlined_call_operand.vmem [shape: f32[2,1,32], index: 6, kind: input, shape index: {}]   ;;  %s4141_s7 = inlined_call_operand.vmem [shape: f32[2,1,32], index: 7, kind: input, shape index: {}]   ;;  %s4142_s8 = inlined_call_operand.vmem [shape: f32[2,1,32], index: 8, kind: input, shape index: {}]   ;;  %s4143_s9 = inlined_call_operand.vmem [shape: f32[2,32,128], index: 9, kind: input, shape index: {}]   ;;  %s4144_s10 = inlined_call_operand.vmem [shape: f32[2,1,128], index: 10, kind: input, shape index: {}]   ;;  %s4145_s11 = inlined_call_operand.vmem [shape: f32[2,128,32], index: 11, kind: input, shape index: {}]   ;;  %s4146_s12 = inlined_call_operand.vmem [shape: f32[2,1,32], index: 12, kind: input, shape index: {}]   ;;  %s4147_s13 = inlined_call_operand.vmem [shape: f32[32,16], index: 13, kind: input, shape index: {}]   ;;  %s4148_s14 = inlined_call_operand.vmem [shape: f32[16,4], index: 14, kind: input, shape index: {}]   ;;  %s4149_s15 = inlined_call_operand.hbm [shape: f32[2,1,4], index: 15, kind: output, shape index: {0}]   ;;  %s4150_s16 = inlined_call_operand.hbm [shape: f32[2,2,4,8,8], index: 16, kind: output, shape index: {1}]  }
   0x1   :  { %4176 = sst [smem:[#allocation26_spill]] %s4134_s0 }
   0x2   :  { %4177 = sst [smem:[#allocation27_spill]] %s4135_s1 }
   0x3   :  { %4178 = sst [smem:[#allocation28_spill]] %s4138_s4 }
   0x4   :  { %4179 = sst [smem:[#allocation29_spill]] %s4139_s5 }
   0x5   :  { %4180 = sst [smem:[#allocation30_spill]] %s4140_s6 }
   0x6   :  { %4181 = sst [smem:[#allocation31_spill]] %s4145_s11 }
   0x7   :  { %4182 = sst [smem:[#allocation32_spill]] %s4146_s12 }
   0x8   :  { %4183 = sst [smem:[#allocation33_spill]] %s4147_s13 }
   0x9   :  { %4184 = sst [smem:[#allocation34_spill]] %s4148_s14 }
   0xa   :  { %4185 = sst [smem:[#allocation35_spill]] %s4149_s15 }
   0xb   :  { %4186 = sst [smem:[#allocation36_spill]] %s4150_s16 }
   0xc   :  { %22 = vsyncpa [#allocation4], 0 }
   0xd   :  { %24 = vsyncpa [#allocation4 + $0x1], 0 }
   0xe   :  { %25 = vsyncpa [#allocation6], 0 }
   0xf   :  { %27 = vsyncpa [#allocation6 + $0x1], 0  ;;  %s3551_s21 = smov 0   ;;  %s3553_s22 = smov 0  }
  0x10   :  { %s3555_s23 = smov 0   ;;  %s3557_s24 = smov 0  }
  0x11   :  { %s3559_s25 = smov 0   ;;  %s3561_s26 = smov 0  }
  0x12   :  { %s3563_s27 = smov 0   ;;  %s3565_s28 = smov 0  }
  0x13   :  { %s3567_s29 = smov 0   ;;  %s3569_s30 = smov 0  }
  0x14   :  { %s3571_s0 = smov 0  }
  0x15 LB: > { %4187 = sst [smem:[#allocation9_spill]] %s3403_s21  ;;  %s2857_s17 = sadd.s32 4294967295, %s3443_s0   ;;  %s3443_s0 = sphi %s3571_s0, %s33_s0   ;;  %s3439_s30 = sphi %s3569_s30, %s4251_s30   ;;  %s3435_s29 = sphi %s3567_s29, %s4250_s29   ;;  %s3431_s28 = sphi %s3565_s28, %s4249_s28   ;;  %s3427_s27 = sphi %s3563_s27, %s4248_s27   ;;  %s3423_s26 = sphi %s3561_s26, %s4247_s26   ;;  %s3419_s25 = sphi %s3559_s25, %s4253_s25   ;;  %s3415_s24 = sphi %s3557_s24, %s4252_s24   ;;  %s3411_s23 = sphi %s3555_s23, %s4245_s23   ;;  %s3407_s22 = sphi %s3553_s22, %s4244_s22   ;;  %s3403_s21 = sphi %s3551_s21, %s4243_s21  }
  0x16   : > { %4188 = sst [smem:[#allocation10_spill]] %s3407_s22  ;;  %s2858_s18 = sadd.s32 4294967294, %s3443_s0  }
  0x17   : > { %4189 = sst [smem:[#allocation11_spill]] %s3411_s23  ;;  %s42_s19 = sadd.s32 1, %s3435_s29 }
  0x18   : > { %4190 = sst [smem:[#allocation12_spill]] %s3415_s24  ;;  %s45_s20 = sadd.s32 1, %s3439_s30 }
  0x19   : > { %4191 = sst [smem:[#allocation13_spill]] %s3423_s26  ;;  %p43_p0 = scmp.ge.s32.totalorder %s42_s19, 2 }
  0x1a   : > { %4192 = sst [smem:[#allocation14_spill]] %s3431_s28  ;;  %s427_s16 = sadd.s32 1, %s3423_s26 }
  0x1b   : > { %4193 = sst [smem:[#allocation15_spill]] %s3435_s29  ;;  %p437_p1 = scmp.ne.s32.totalorder %s3423_s26, %s3419_s25 }
  0x1c   : > { %4194 = sst [smem:[#allocation16_spill]] %s3439_s30  ;;  %p3613_p2 = scmp.eq.s32.totalorder %s2857_s17, 3 }
  0x1d   : > { %4195 = sst [smem:[#allocation17_spill]] %s3443_s0  ;;  %s4255_s19 = smov (%p43_p0, %s42_s19), 0 }
  0x1e   : > { %4197 = sst [smem:[#allocation18_spill]] %s4255_s19  ;;  %s4257_s20 = smov (!%p43_p0, %s45_s20), %s3439_s30 }
  0x1f   : > { %p3622_p3 = por %p3613_p2, %p437_p1  ;;  %p443_p4 = scmp.ne.s32.totalorder %s3419_s25, %s3415_s24 }
  0x20   : > { %p47_p5 = scmp.ge.s32.totalorder %s4257_s20, 2  ;;  %p3628_p6 = scmp.eq.s32.totalorder %s2858_s18, 3 }
  0x21   : > { %s4198_s14 = scalar_select %p3622_p3, 1, 0 }
  0x22   : > { %s450_s13 = ssub.s32 %s3435_s29, %s4255_s19  ;;  %s455_s1 = sadd.s32 1, %s3411_s23 }
  0x23   : > { %4199 = sst [smem:[#allocation19_spill]] %s4198_s14  ;;  %s4259_s20 = smov (%p47_p5, %s4257_s20), 0 }
  0x24   : > { %4201 = sst [smem:[#allocation20_spill]] %s4259_s20  ;;  %p3639_p7 = por %p3628_p6, %p443_p4 }
  0x25   : > { %p465_p8 = scmp.ne.s32.totalorder %s3411_s23, %s3407_s22  ;;  %s424_s24 = ssub.s32 %s3439_s30, %s4259_s20 }
  0x26   : > { %s4202_s12 = scalar_select %p3639_p7, 1, 0 }
  0x27   : > { %p471_p9 = scmp.ne.s32.totalorder %s3407_s22, %s3403_s21  ;;  %p425_p10 = scmp.eq.s32.totalorder %s424_s24, 0 }
  0x28   : > { %4203 = sst [smem:[#allocation21_spill]] %s4202_s12  ;;  %s452_s18 = sor.u32 %s450_s13, %s424_s24 }
  0x29   : > { %p453_p11 = scmp.eq.s32.totalorder %s452_s18, 0  ;;  %p3651_p12 = por %p465_p8, %p3613_p2 }
  0x2a   : > { %s3656_s19 = scalar_select %p425_p10, %s3423_s26, %s427_s16  }
  0x2b   : > { %s4204_s14 = scalar_select %p3651_p12, 1, 0 }
  0x2c   : > { %4206 = sst [smem:[#allocation23_spill]] %s3656_s19  ;;  %p3663_p13 = por %p471_p9, %p3628_p6 }
  0x2d   : > { %4205 = sst [smem:[#allocation22_spill]] %s4204_s14  ;;  %p2861_p0 = scmp.ge.s32.totalorder %s3443_s0, 1 }
  0x2e   : > { %s3659_s29 = scalar_select %p453_p11, %s3411_s23, %s455_s1  }
  0x2f   : > { %s4208_s11 = scalar_select %p3663_p13, 1, 0 }
  0x30   : > { %4207 = sst [smem:[#allocation24_spill]] %s3659_s29  ;;  %p580_p1 = scmp.lt.s32.totalorder %s3443_s0, 5 }
  0x31   : > { %4209 = sst [smem:[#allocation25_spill]] %s4208_s11 }
  0x32   : > { %p581_p4 = pnand %p2861_p0, %p580_p1 }
  0x33   : > { %s4161_s15 = sand.u32 (!%p581_p4), 1, %s3407_s22   ;;  %p674_p2 = scmp.lt.s32.totalorder (!%p581_p4), %s3431_s28, 1 }
  0x34   : > { %584 = sbr.rel (%p581_p4) target bundleno = 3217 (0xc91), region = 80  ;;  %s2862_s1 = sshll.u32 (!%p581_p4), %s4161_s15, 5 }
  0x35   : > { %p678_p5 = scmp.lt.s32.totalorder (!%p581_p4), %s3427_s27, 1  ;;  %s4210_s20 = sld [smem:[#allocation26_spill]] (!%p581_p4) }
  0x36   : > { %s4211_s4 = sld [smem:[#allocation28_spill]] (!%p581_p4)  ;;  %s4212_s5 = sld [smem:[#allocation29_spill]] (!%p581_p4) }
  0x37   : > { %s4214_s30 = sld [smem:[#allocation31_spill]] (!%p581_p4)  ;;  %s4215_s23 = sld [smem:[#allocation32_spill]] (!%p581_p4) }
  0x38   : > { %s4216_s18 = sand.u32 (!%p581_p4), 1, %s3419_s25   ;;  %s3736_s12 = scalar_lea.vmem (!%p581_p4), [#allocation5], %s2862_s1 }
  0x39   : > { %s3734_s11 = scalar_lea.vmem (!%p581_p4), [#allocation3], %s4216_s18  ;;  %p2872_p6 = scmp.ne.s32.totalorder (!%p581_p4), %s3427_s27, 0 }
  0x3b   : > { %s675_s16 = scalar_select %p674_p2, %s3431_s28, 1 }
  0x3c   : > { %s3677_s24 = scalar_select %p678_p5, %s3427_s27, 1 }
  0x3d   : > { %s2863_s17 = sshll.u32 %s675_s16, 3  ;;  %722 = sbr.rel (%p2872_p6) target bundleno = 68 (0x44), region = 84  ;;  %vm724_vm0 = vcmask (!%p2872_p6), 261120  }
  0x3e   : > { %s677_s15 = scalar_lea.vmem %s4210_s20, %s2863_s17  ;;  %s2915_s21 = sshll.u32 %s3677_s24, 5 }
  0x3f   : > { %s3694_s14 = scalar_lea.vmem %s4211_s4, %s2915_s21  ;;  %s3699_s28 = scalar_lea.vmem %s4212_s5, %s2915_s21  ;;  %v723_v0 = vld [vmem:[%s677_s15] sm:$0xff] (!%p2872_p6) }
  0x40   : > { %s3716_s26 = scalar_lea.vmem %s4143_s9, %s2915_s21  ;;  %s710_s4 = scalar_lea.vmem %s4144_s10, %s3677_s24  ;;  %725 = vst.msk [vmem:[#allocation2] sm:$0xff] (!%p2872_p6), %vm724_vm0, %v723_v0 }
  0x41   : > { %s2918_s5 = sshll.u32 %s3677_s24, 7  ;;  %s718_s29 = scalar_lea.vmem %s4215_s23, %s3677_s24 }
  0x42   : > { %s3726_s6 = scalar_lea.vmem %s4214_s30, %s2918_s5 }
  0x44 PF: > { %vm729_vm1 = vcmask 261120   ;;  %v758_v8 = vld [vmem:[%s3694_s14] sm:$0xff]  ;;  %v759_v9 = vld [vmem:[%s3694_s14 + $0x8] sm:$0xff]  ;;  %v760_v10 = vld [vmem:[%s3694_s14 + $0x10] sm:$0xff]  ;;  %v3445_v11 = vmov 0.0|0.0   ;;  %vm3446_vm2 = vmmov 0   ;;  %s4217_s21 = scalar_lea.vmem %s4136_s2, %s3677_s24  ;;  %s4218_s30 = scalar_lea.vmem %s4137_s3, %s3677_s24  ;;  %v850_v30 = vlaneseq }
  0x45   : > { %3101 = vmatprep.subr.bf16.mxu1 %v3445_v11  ;;  %v3102_v12 = vpack.c.bf16 %v759_v9, %v758_v8  ;;  %v761_v13 = vld [vmem:[%s3694_s14 + $0x18] sm:$0xff]  ;;  %v3447_v14 = vmov 0.0   ;;  %v2873_v20 = vld [vmem:[%s4217_s21] ss:$0 sm:$0xff]  ;;  %s3448_s23 = smov 104   ;;  %s3449_s0 = smov 120  }
  0x46   : > { %2983 = vmatprep.mubr.msk.f32.mxu1 %vm3446_vm2, %v3447_v14  ;;  %2996 = vmatprep.subr.mxu0 %v3447_v14  ;;  %v3105_v15 = vpack.c.bf16 %v761_v13, %v760_v10  ;;  %v2874_v22 = vld [vmem:[%s4218_s30] ss:$0 sm:$0xff]  ;;  %s3450_s22 = smov 112   ;;  %s3451_s16 = smov 96   ;;  %v3452_v31 = vmov 0   ;;  %v3789_v35 = vshrl.u32 %v850_v30, 7 }
  0x47   : > { %v3739_v1 = vld [vmem:[#allocation2] sm:$0xff]  ;;  %2998 = vmatprep.mubr.msk.f32.mxu0 %vm3446_vm2, %v3447_v14  ;;  %3103 = vmatpush3.bf16.msra.mxu1 %v3102_v12  ;;  %v3453_v32 = vmov 1966171168   ;;  %s4219_s19 = sld [smem:[#allocation27_spill]]  ;;  %v3454_v48 = vmov 1983009808  }
  0x48   : > { %v730_v2 = vsel %vm729_vm1, %v3739_v1, 0.0  ;;  %3104 = vmatprep.subr.bf16.mxu1 %v3445_v11  ;;  %3271 = vset.pattern.permute.xlu1 %v3452_v31  ;;  %v1298_v33 = vunpack.c.l.s4 %v3453_v32  ;;  %v1315_v39 = vsub.s32 0, %v3789_v35  ;;  %v848_v49 = vunpack.c.l.s4 %v3454_v48  ;;  %s3456_s17 = smov 64   ;;  %s4175_s18 = smov 8  }
  0x49   : > { %731 = vadd.xlane.f32.xlu0 %v730_v2  ;;  %v3455_v51 = vmov 1934713408   ;;  %vm1349_vm3 = vcmask 64512   ;;  %s3459_s5 = smov 24   ;;  %vm2143_vm4 = vcmask 130048   ;;  %vm2145_vm5 = vcmask 195584  }
  0x4a   : > { %3272 = vset.pattern.permute.xlu0 %v3452_v31  ;;  %v1299_v36 = vunpack.c.0.s8 %v1298_v33  ;;  %v849_v50 = vunpack.c.0.s8 %v848_v49  ;;  %v880_v52 = vunpack.c.l.s4 %v3455_v51  ;;  %s4220_s15 = sld [smem:[#allocation30_spill]]  ;;  %p2905_p8 = scmp.ne.s32.totalorder %s3427_s27, 1 }
  0x4b   : > { %3106 = vmatpush3.bf16.msra.mxu1 %v3105_v15  ;;  %vm3461_vm6 = vmmov (!%p2905_p8), 0   ;;  %vm2607_vm7 = vcmask (!%p2905_p8), 24576  }
  0x4c   : > { %2986 = vmatprep.subr.mxu1 %v3447_v14  ;;  %v1302_v38 = vsub.s32 %v1299_v36, %v3789_v35  ;;  %v3798_v56 = vsub.s32 %v849_v50, %v3789_v35  ;;  %v881_v59 = vunpack.c.0.s8 %v880_v52 }
  0x4d   : > { %v2883_v34 = vld.sshfl [vmem:[%s4219_s19] sm:$0x33 pattern:$0x75316420] }
  0x4e   : > { %v1296_v37 = vcombine.high %v2883_v34, %v2883_v34  ;;  %v1303_v40 = vrot.slane %v2883_v34, %v1302_v38  ;;  %v3809_v2 = vsub.s32 %v881_v59, %v3789_v35 }
  0x50   : > { %v1310_v41 = vrot.slane %v1296_v37, %v1302_v38  ;;  %v1316_v42 = vrot.slane %v1303_v40, %v1315_v39  ;;  %v1311_v43 = vcombine.high %v1303_v40, %v1303_v40  ;;  %s4221_s1 = scalar_lea.vmem %s4220_s15, %s3677_s24 }
  0x52   : > { %v1320_v44 = vrot.slane %v1310_v41, %v1315_v39  ;;  %v1324_v45 = vrot.slane %v1311_v43, %v1315_v39  ;;  %v1312_v46 = vcombine.high %v1310_v41, %v1310_v41 }
  0x54   : > { %v1328_v47 = vrot.slane %v1312_v46, %v1315_v39 }
  0xd6   : > { %v732_v3 = vpop.xlane.xlu0 %731 }
  0xd7   : > { %v734_v4 = vmul.f32 0.03125, %v732_v3 }
  0xd9   : > { %v735_v5 = vsub.f32 %v3739_v1, %v734_v4 }
  0xdb   : > { %v736_v6 = vmul.f32 %v735_v5, %v735_v5 }
  0xdd   : > { %v737_v7 = vsel %vm729_vm1, %v736_v6, 0.0 }
  0xde   : > { %738 = vadd.xlane.f32.xlu0 %v737_v7 }
 0x16b   : > { %v739_v16 = vpop.xlane.xlu0 %738 }
 0x16c   : > { %v740_v17 = vmul.f32 0.03125, %v739_v16 }
 0x16e   : > { %v741_v18 = vadd.f32 1e-05, %v740_v17 }
 0x170   : > { %3273 = vrsqrt.f32 %v741_v18 }
 0x17a   : > { %v3274_v19 = vpop.eup %3273 }
 0x17b   : > { %v743_v21 = vmul.f32 %v3274_v19, %v735_v5 }
 0x17d   : > { %v750_v23 = vmul.f32 %v2873_v20, %v743_v21 }
 0x17f   : > { %v757_v24 = vadd.f32 %v2874_v22, %v750_v23 }
 0x181   : > { %2984 = vmatmul.mubr.msk.f32.vlgmr.msra.gmra.mrb[0].mxu1 %vm729_vm1, %v757_v24 }
 0x182   : > { %2988 = vmatprep.mubr.msk.f32.mxu1 %vm3446_vm2, %v3447_v14 }
 0x254   : > { %v3770_v25 = vpop.f32.mrb[0].mxu1 }
 0x255   : > { %842 = vrot.lane.b32.xlu0 %v3770_v25, %s3448_s23  ;;  %836 = vrot.lane.b32.xlu1 %v3770_v25, %s3449_s0  ;;  %v2985_v26 = vpop.f32.mrb[1].mxu1  ;;  %s4222_s23 = scalar_lea.vmem %s4141_s7, %s3677_s24 }
 0x259   : > { %839 = vrot.lane.b32.xlu1 %v3770_v25, %s3450_s22  ;;  %1338 = vperm.xlu0 %3272, %v1324_v45  }
 0x25d   : > { %981 = vrot.lane.b32.xlu1 %v3770_v25, %s3451_s16 }
 0x2c7   : > { %v3776_v27 = vpop.permute.xlu1 %836  ;;  %v3782_v29 = vpop.permute.xlu0 %842 }
 0x2c8   : > { %983 = vrot.lane.b32.xlu1 %v3776_v27, %s3451_s16  ;;  %v861_v57 = vcombine.low %v3776_v27, %v3782_v29  ;;  %v862_v58 = vcombine.high %v3776_v27, %v3782_v29 }
 0x2ca   : > { %v869_v63 = vrot.slane %v861_v57, %v3798_v56  ;;  %v876_v0 = vrot.slane %v862_v58, %v3798_v56 }
 0x2cb   : > { %v3779_v28 = vpop.permute.xlu1 %839 }
 0x2cc   : > { %985 = vrot.lane.b32.xlu1 %v3779_v28, %s3451_s16  ;;  %v845_v53 = vcombine.low %v3770_v25, %v3779_v28  ;;  %v846_v54 = vcombine.high %v3770_v25, %v3779_v28 }
 0x2ce   : > { %v853_v60 = vrot.slane %v845_v53, %v3798_v56  ;;  %v860_v61 = vrot.slane %v846_v54, %v3798_v56 }
 0x2cf   : > { %v982_v55 = vpop.permute.xlu1 %981 }
 0x2d0   : > { %987 = vrot.lane.b32.xlu1 %v3782_v29, %s3451_s16  ;;  %v877_v3 = vcombine.low %v853_v60, %v869_v63  ;;  %v878_v4 = vcombine.high %v853_v60, %v869_v63  ;;  %v893_v5 = vcombine.low %v860_v61, %v876_v0  ;;  %v894_v6 = vcombine.high %v860_v61, %v876_v0  ;;  %s4223_s16 = scalar_lea.vmem %s4142_s8, %s3677_s24 }
 0x2d2   : > { %v885_v10 = vrot.slane %v877_v3, %v3809_v2  ;;  %v892_v12 = vrot.slane %v878_v4, %v3809_v2  ;;  %v901_v13 = vrot.slane %v893_v5, %v3809_v2  ;;  %v908_v15 = vrot.slane %v894_v6, %v3809_v2 }
 0x2d4   : > { %1330 = vperm.xlu1 %3271, %v1316_v42   ;;  %v913_v23 = vcombine.low %v885_v10, %v892_v12  ;;  %v2876_v24 = vcombine.high %v885_v10, %v892_v12  ;;  %v929_v26 = vcombine.low %v901_v13, %v908_v15  ;;  %v2877_v31 = vcombine.high %v901_v13, %v908_v15 }
 0x2d6   : > { %v920_v41 = vrot.slane %v913_v23, %v3798_v56  ;;  %v928_v42 = vrot.slane %v2876_v24, %v3798_v56  ;;  %v936_v43 = vrot.slane %v929_v26, %v3798_v56 }
 0x2d8   : > { %1334 = vperm.xlu1 %3271, %v1320_v44   ;;  %v944_v44 = vrot.slane %v2877_v31, %v3798_v56  ;;  %v945_v53 = vcombine.low %v920_v41, %v928_v42 }
 0x2da   : > { %v961_v54 = vcombine.low %v936_v43, %v944_v44  ;;  %v962_v57 = vcombine.high %v936_v43, %v944_v44  ;;  %v953_v4 = vrot.slane %v945_v53, %v3809_v2 }
 0x2dc   : > { %1342 = vperm.xlu1 %3271, %v1328_v47   ;;  %v969_v5 = vrot.slane %v961_v54, %v3809_v2 }
 0x2de   : > { %v977_v10 = vcombine.low %v953_v4, %v969_v5  ;;  %v978_v15 = vcombine.high %v953_v4, %v969_v5 }
 0x33a   : > { %v984_v62 = vpop.permute.xlu1 %983 }
 0x33e   : > { %v986_v7 = vpop.permute.xlu1 %985 }
 0x33f   : > { %v993_v8 = vcombine.low %v982_v55, %v986_v7  ;;  %v994_v9 = vcombine.high %v982_v55, %v986_v7  ;;  %v946_v55 = vcombine.high %v920_v41, %v928_v42  ;;  %v976_v7 = vrot.slane %v962_v57, %v3809_v2 }
 0x341   : > { %v1001_v19 = vrot.slane %v993_v8, %v3798_v56  ;;  %v1008_v20 = vrot.slane %v994_v9, %v3798_v56  ;;  %v960_v6 = vrot.slane %v946_v55, %v3809_v2 }
 0x342   : > { %v988_v16 = vpop.permute.xlu1 %987 }
 0x343   : > { %v1009_v17 = vcombine.low %v984_v62, %v988_v16  ;;  %v1010_v18 = vcombine.high %v984_v62, %v988_v16  ;;  %v979_v12 = vcombine.low %v960_v6, %v976_v7 }
 0x345   : > { %v1017_v21 = vrot.slane %v1009_v17, %v3798_v56  ;;  %v1024_v22 = vrot.slane %v1010_v18, %v3798_v56  ;;  %v980_v17 = vcombine.high %v960_v6, %v976_v7  ;;  %v1280_v18 = vand.u32 127, %v850_v30 }
 0x347   : > { %v1025_v32 = vcombine.low %v1001_v19, %v1017_v21  ;;  %v1026_v33 = vcombine.high %v1001_v19, %v1017_v21  ;;  %v1041_v34 = vcombine.low %v1008_v20, %v1024_v22  ;;  %v1042_v36 = vcombine.high %v1008_v20, %v1024_v22 }
 0x348   : > { %v1281_v19 = vsub.s32 %v3789_v35, %v1280_v18 }
 0x349   : > { %v1033_v37 = vrot.slane %v1025_v32, %v3809_v2  ;;  %v1040_v38 = vrot.slane %v1026_v33, %v3809_v2  ;;  %v1049_v39 = vrot.slane %v1041_v34, %v3809_v2  ;;  %v1056_v40 = vrot.slane %v1042_v36, %v3809_v2  ;;  %v1339_v32 = vpop.permute.xlu0 %1338 }
 0x34a   : > { %v1283_v20 = vsub.s32 0, %v1281_v19 }
 0x34b   : > { %v1061_v45 = vcombine.low %v1033_v37, %v1040_v38  ;;  %v2878_v46 = vcombine.high %v1033_v37, %v1040_v38  ;;  %v1077_v47 = vcombine.low %v1049_v39, %v1056_v40  ;;  %v2879_v48 = vcombine.high %v1049_v39, %v1056_v40 }
 0x34c   : > { %v2882_v21 = vmin.u32 %v1283_v20, %v1281_v19 }
 0x34d   : > { %v1068_v49 = vrot.slane %v1061_v45, %v3798_v56  ;;  %v1076_v50 = vrot.slane %v2878_v46, %v3798_v56  ;;  %v1084_v51 = vrot.slane %v1077_v47, %v3798_v56  ;;  %v1092_v52 = vrot.slane %v2879_v48, %v3798_v56 }
 0x34e   : > { %v1285_v22 = vcvt.s32.f32 %v2882_v21 }
 0x34f   : > { %v1093_v58 = vcombine.low %v1068_v49, %v1076_v50  ;;  %v1109_v59 = vcombine.low %v1084_v51, %v1092_v52  ;;  %v1094_v60 = vcombine.high %v1068_v49, %v1076_v50  ;;  %v1110_v61 = vcombine.high %v1084_v51, %v1092_v52 }
 0x350   : > { %v1286_v24 = vsub.f32 0.0, %v1285_v22 }
 0x351   : > { %v1101_v62 = vrot.slane %v1093_v58, %v3809_v2  ;;  %v1117_v63 = vrot.slane %v1109_v59, %v3809_v2  ;;  %v1108_v0 = vrot.slane %v1094_v60, %v3809_v2  ;;  %v1124_v3 = vrot.slane %v1110_v61, %v3809_v2 }
 0x352   : > { %v1347_v40 = vmul.f32 %v1339_v32, %v1286_v24 }
 0x353   : > { %v1125_v8 = vcombine.low %v1101_v62, %v1117_v63  ;;  %v1127_v9 = vcombine.low %v1108_v0, %v1124_v3  ;;  %v1126_v13 = vcombine.high %v1101_v62, %v1117_v63  ;;  %v1128_v16 = vcombine.high %v1108_v0, %v1124_v3  ;;  %v1331_v23 = vpop.permute.xlu1 %1330 }
 0x354   : > { %v1345_v26 = vmul.f32 %v1331_v23, %v1286_v24 }
 0x355   : > { %2987 = vmatpush3.xpose.msk.msra.mxu1 %vm1349_vm3, %v1125_v8  ;;  %2997 = vmatpush3.xpose.msk.msra.mxu0 %vm1349_vm3, %v1127_v9 }
 0x356   : > { %2991 = vmatprep.subr.mxu1 %v3447_v14  ;;  %3006 = vmatprep.subr.mxu0 %v3447_v14 }
 0x357   : > { %v1335_v31 = vpop.permute.xlu1 %1334 }
 0x358   : > { %2989 = vmatmul.mubr.msk.f32.vlgmr.msra.gmra.mrb[2].mxu1 %vm1349_vm3, %v977_v10  ;;  %2999 = vmatmul.mubr.msk.f32.vlgmr.msra.gmra.mrb[0].mxu0 %vm1349_vm3, %v979_v12  ;;  %v1346_v39 = vmul.f32 %v1335_v31, %v1286_v24 }
 0x359   : > { %2992 = vmatpush3.xpose.msk.msra.mxu1 %vm1349_vm3, %v1126_v13  ;;  %2993 = vmatprep.mubr.msk.f32.mxu1 %vm3446_vm2, %v3447_v14 }
 0x35a   : > { %3001 = vmatprep.subr.mxu1 %v3447_v14  ;;  %3008 = vmatprep.mubr.msk.f32.mxu0 %vm3446_vm2, %v3447_v14 }
 0x35b   : > { %v1343_v30 = vpop.permute.xlu1 %1342 }
 0x35c   : > { %2994 = vmatmul.mubr.msk.f32.vlgmr.msra.gmra.mrb[4].mxu1 %vm1349_vm3, %v978_v15  ;;  %v1348_v44 = vmul.f32 %v1343_v30, %v1286_v24 }
 0x35d   : > { %3002 = vmatpush3.xpose.msk.msra.mxu1 %vm1349_vm3, %v1128_v16  ;;  %3003 = vmatprep.mubr.msk.f32.mxu1 %vm3446_vm2, %v3447_v14 }
 0x35e   : > { %3011 = vmatprep.subr.mxu1 %v3447_v14 }
 0x360   : > { %3004 = vmatmul.mubr.msk.f32.vlgmr.msra.gmra.mrb[6].mxu1 %vm1349_vm3, %v980_v17 }
 0x361   : > { %3013 = vmatprep.mubr.msk.f32.mxu1 %vm3446_vm2, %v3447_v14 }
 0x42b   : > { %v1422_v33 = vpop.f32.mrb[2].mxu1  ;;  %v1574_v34 = vpop.f32.mrb[0].mxu0 }
 0x42c   : > { %v1423_v36 = vadd.f32 %v1422_v33, %v1345_v26  ;;  %v2990_v37 = vpop.f32.mrb[3].mxu1  ;;  %v3000_v38 = vpop.f32.mrb[1].mxu0  ;;  %v1575_v45 = vadd.f32 %v1574_v34, %v1347_v40 }
 0x42e   : > { %v1654_v41 = vsel %vm1349_vm3, %v1423_v36, -inf  ;;  %v1660_v50 = vsel %vm1349_vm3, %v1575_v45, -inf }
 0x42f   : > { %1655 = vmax.xlane.f32.xlu1 %v1654_v41  ;;  %v1498_v35 = vpop.f32.mrb[4].mxu1 }
 0x430   : > { %v1499_v42 = vadd.f32 %v1498_v35, %v1346_v39  ;;  %v2995_v43 = vpop.f32.mrb[5].mxu1 }
 0x432   : > { %v1657_v46 = vsel %vm1349_vm3, %v1499_v42, -inf }
 0x433   : > { %1658 = vmax.xlane.f32.xlu0 %v1657_v46  ;;  %v1650_v47 = vpop.f32.mrb[6].mxu1 }
 0x434   : > { %v1651_v48 = vadd.f32 %v1650_v47, %v1348_v44  ;;  %v3005_v49 = vpop.f32.mrb[7].mxu1 }
 0x436   : > { %v1663_v51 = vsel %vm1349_vm3, %v1651_v48, -inf }
 0x437   : > { %1661 = vmax.xlane.f32.xlu0 %v1660_v50  ;;  %1664 = vmax.xlane.f32.xlu1 %v1663_v51 }
 0x448   : > { %1131 = vrot.lane.b32.xlu1 %v3776_v27, %s3456_s17 }
 0x44d   : > { %1129 = vrot.lane.b32.xlu0 %v3770_v25, %s3456_s17 }
 0x4bc   : > { %v1656_v52 = vpop.xlane.xlu1 %1655 }
 0x4bd   : > { %v1666_v53 = vsub.f32 %v1423_v36, %v1656_v52 }
 0x4bf   : > { %v1670_v54 = vmul.f32 1.442695, %v1666_v53 }
 0x4c0   : > { %v1659_v55 = vpop.xlane.xlu0 %1658 }
 0x4c1   : > { %3275 = vpow2.f32 %v1670_v54  ;;  %v1667_v57 = vsub.f32 %v1499_v42, %v1659_v55 }
 0x4c3   : > { %v1672_v58 = vmul.f32 1.442695, %v1667_v57 }
 0x4c4   : > { %v1662_v59 = vpop.xlane.xlu0 %1661  ;;  %v1665_v60 = vpop.xlane.xlu1 %1664 }
 0x4c5   : > { %3277 = vpow2.f32 %v1672_v58  ;;  %v1668_v61 = vsub.f32 %v1575_v45, %v1662_v59  ;;  %v1669_v62 = vsub.f32 %v1651_v48, %v1665_v60 }
 0x4c7   : > { %v1674_v63 = vmul.f32 1.442695, %v1668_v61  ;;  %v1676_v0 = vmul.f32 1.442695, %v1669_v62 }
 0x4c8   : > { %v1130_v9 = vpop.permute.xlu0 %1129  ;;  %v1132_v10 = vpop.permute.xlu1 %1131 }
 0x4c9   : > { %3279 = vpow2.f32 %v1674_v63 }
 0x4ca   : > { %3281 = vpow2.f32 %v1676_v0 }
 0x4cb   : > { %v3276_v27 = vpop.eup %3275 }
 0x4cc   : > { %v1678_v3 = vsel %vm1349_vm3, %v3276_v27, 0.0 }
 0x4cd   : > { %1679 = vadd.xlane.f32.xlu0 %v1678_v3  ;;  %v2147_v3 = vld [vmem:[%s3699_s28] sm:$0xff] }
 0x4cf   : > { %v3278_v25 = vpop.eup %3277 }
 0x4d0   : > { %v1681_v4 = vsel %vm1349_vm3, %v3278_v25, 0.0 }
 0x4d1   : > { %1682 = vadd.xlane.f32.xlu1 %v1681_v4 }
 0x4d3   : > { %v3280_v5 = vpop.eup %3279 }
 0x4d4   : > { %v3282_v6 = vpop.eup %3281  ;;  %v1684_v7 = vsel %vm1349_vm3, %v3280_v5, 0.0 }
 0x4d5   : > { %1685 = vadd.xlane.f32.xlu0 %v1684_v7  ;;  %v1687_v8 = vsel %vm1349_vm3, %v3282_v6, 0.0 }
 0x4d6   : > { %1688 = vadd.xlane.f32.xlu1 %v1687_v8 }
 0x4e7   : > { %1133 = vrot.lane.b32.xlu1 %v3779_v28, %s3456_s17 }
 0x4eb   : > { %1135 = vrot.lane.b32.xlu0 %v3782_v29, %s3456_s17 }
 0x55a   : > { %v1680_v12 = vpop.xlane.xlu0 %1679 }
 0x55b   : > { %3283 = vrcp.f32 %v1680_v12 }
 0x55e   : > { %v1683_v13 = vpop.xlane.xlu1 %1682 }
 0x55f   : > { %3285 = vrcp.f32 %v1683_v13 }
 0x562   : > { %v1686_v15 = vpop.xlane.xlu0 %1685 }
 0x563   : > { %3287 = vrcp.f32 %v1686_v15  ;;  %v1689_v16 = vpop.xlane.xlu1 %1688 }
 0x564   : > { %3289 = vrcp.f32 %v1689_v16 }
 0x565   : > { %v3284_v17 = vpop.eup %3283 }
 0x566   : > { %v1694_v18 = vmul.f32 %v3284_v17, %v3276_v27  ;;  %v1136_v19 = vpop.permute.xlu0 %1135 }
 0x567   : > { %v1157_v20 = vcombine.low %v1132_v10, %v1136_v19  ;;  %v1158_v28 = vcombine.high %v1132_v10, %v1136_v19  ;;  %v1134_v21 = vpop.permute.xlu1 %1133 }
 0x568   : > { %1698 = vst.msk [vmem:[%s3736_s12] sm:$0xff] %vm1349_vm3, %v1694_v18  ;;  %v1141_v29 = vcombine.low %v1130_v9, %v1134_v21  ;;  %v1142_v22 = vcombine.high %v1130_v9, %v1134_v21 }
 0x569   : > { %v3286_v23 = vpop.eup %3285  ;;  %v1165_v24 = vrot.slane %v1157_v20, %v3798_v56  ;;  %v1172_v26 = vrot.slane %v1158_v28, %v3798_v56 }
 0x56a   : > { %v1695_v31 = vmul.f32 %v3286_v23, %v3278_v25  ;;  %v1149_v32 = vrot.slane %v1141_v29, %v3798_v56  ;;  %v1156_v33 = vrot.slane %v1142_v22, %v3798_v56  ;;  %v2148_v25 = vld [vmem:[%s3699_s28 + $0x8] sm:$0xff] }
 0x56b   : > { %v3108_v4 = vpack.c.bf16 %v2148_v25, %v2147_v3 }
 0x56c   : > { %1699 = vst.msk [vmem:[%s3736_s12 + $0x8] sm:$0xff] %vm1349_vm3, %v1695_v31  ;;  %v1173_v34 = vcombine.low %v1149_v32, %v1165_v24  ;;  %v1174_v36 = vcombine.high %v1149_v32, %v1165_v24  ;;  %v1189_v37 = vcombine.low %v1156_v33, %v1172_v26  ;;  %v1190_v38 = vcombine.high %v1156_v33, %v1172_v26  ;;  %v2149_v26 = vld [vmem:[%s3699_s28 + $0x10] sm:$0xff] }
 0x56d   : > { %v3288_v39 = vpop.eup %3287 }
 0x56e   : > { %v3290_v40 = vpop.eup %3289  ;;  %v1696_v41 = vmul.f32 %v3288_v39, %v3280_v5  ;;  %v1181_v30 = vrot.slane %v1173_v34, %v3809_v2  ;;  %v1188_v35 = vrot.slane %v1174_v36, %v3809_v2  ;;  %v1197_v42 = vrot.slane %v1189_v37, %v3809_v2 }
 0x56f   : > { %v1697_v43 = vmul.f32 %v3290_v40, %v3282_v6  ;;  %v1204_v44 = vrot.slane %v1190_v38, %v3809_v2 }
 0x570   : > { %1700 = vst.msk [vmem:[%s3736_s12 + $0x10] sm:$0xff] %vm1349_vm3, %v1696_v41  ;;  %v1209_v45 = vcombine.low %v1181_v30, %v1188_v35  ;;  %v2880_v46 = vcombine.high %v1181_v30, %v1188_v35 }
 0x571   : > { %1701 = vst.msk [vmem:[%s3736_s12 + $0x18] sm:$0xff] %vm1349_vm3, %v1697_v43  ;;  %v1225_v47 = vcombine.low %v1197_v42, %v1204_v44  ;;  %v2881_v48 = vcombine.high %v1197_v42, %v1204_v44 }
 0x572   : > { %v1216_v49 = vrot.slane %v1209_v45, %v3798_v56  ;;  %v1224_v50 = vrot.slane %v2880_v46, %v3798_v56 }
 0x573   : > { %v1232_v51 = vrot.slane %v1225_v47, %v3798_v56  ;;  %v1240_v52 = vrot.slane %v2881_v48, %v3798_v56 }
 0x574   : > { %v1241_v53 = vcombine.low %v1216_v49, %v1224_v50  ;;  %v1242_v54 = vcombine.high %v1216_v49, %v1224_v50 }
 0x575   : > { %v1257_v55 = vcombine.low %v1232_v51, %v1240_v52  ;;  %v1258_v57 = vcombine.high %v1232_v51, %v1240_v52 }
 0x576   : > { %v1249_v58 = vrot.slane %v1241_v53, %v3809_v2  ;;  %v1256_v60 = vrot.slane %v1242_v54, %v3809_v2 }
 0x577   : > { %v1265_v59 = vrot.slane %v1257_v55, %v3809_v2  ;;  %v1272_v61 = vrot.slane %v1258_v57, %v3809_v2 }
 0x579   : > { %v1273_v62 = vcombine.low %v1249_v58, %v1265_v59  ;;  %v1274_v63 = vcombine.high %v1249_v58, %v1265_v59  ;;  %v1275_v0 = vcombine.low %v1256_v60, %v1272_v61  ;;  %v1276_v27 = vcombine.high %v1256_v60, %v1272_v61  ;;  %v2898_v61 = vld [vmem:[%s4221_s1] ss:$0 sm:$0xff] }
 0x57b   : > { %3007 = vmatpush3.msra.mxu0 %v1273_v62  ;;  %3012 = vmatpush3.msra.mxu1 %v1274_v63 }
 0x57c   : > { %3009 = vmatmul.mubr.msk.f32.vlgmr.msra.gmra.mrb[2].mxu0 %vm1349_vm3, %v1694_v18  ;;  %3014 = vmatmul.mubr.msk.f32.vlgmr.msra.gmra.mrb[8].mxu1 %vm1349_vm3, %v1695_v31  ;;  %v2150_v31 = vld [vmem:[%s3699_s28 + $0x18] sm:$0xff]  ;;  %s3457_s28 = smov 16  }
 0x57d   : > { %3016 = vmatprep.subr.mxu0 %v3447_v14  ;;  %3021 = vmatprep.subr.mxu1 %v3447_v14  ;;  %v3111_v37 = vpack.c.bf16 %v2150_v31, %v2149_v26  ;;  %v2355_v26 = vld [vmem:[%s3726_s6 + $0x48] sm:$0xff] }
 0x57e   : > { %3017 = vmatpush3.msra.mxu0 %v1275_v0  ;;  %3022 = vmatpush3.msra.mxu1 %v1276_v27 }
 0x57f   : > { %3018 = vmatprep.mubr.msk.f32.mxu0 %vm3446_vm2, %v3447_v14  ;;  %3023 = vmatprep.mubr.msk.f32.mxu1 %vm3446_vm2, %v3447_v14 }
 0x580   : > { %3019 = vmatmul.mubr.msk.f32.vlgmr.msra.gmra.mrb[4].mxu0 %vm1349_vm3, %v1696_v41  ;;  %3024 = vmatmul.mubr.msk.f32.vlgmr.msra.gmra.mrb[10].mxu1 %vm1349_vm3, %v1697_v43 }
 0x581   : > { %3107 = vmatprep.subr.bf16.mxu1 %v3445_v11  ;;  %3034 = vmatprep.mubr.msk.f32.mxu1 %vm3446_vm2, %v3447_v14 }
 0x582   : > { %3119 = vmatprep.subr.bf16.mxu0 %v3445_v11  ;;  %3080 = vmatprep.mubr.msk.f32.mxu0 %vm3446_vm2, %v3447_v14 }
 0x583   : > { %3109 = vmatpush3.bf16.msra.mxu1 %v3108_v4 }
 0x584   : > { %3110 = vmatprep.subr.bf16.mxu1 %v3445_v11 }
 0x587   : > { %3112 = vmatpush3.bf16.msra.mxu1 %v3111_v37  ;;  %v2359_v37 = vld [vmem:[%s3726_s6 + $0x68] sm:$0xff] }
 0x588   : > { %3113 = vmatprep.subr.bf16.mxu1 %v3445_v11 }
 0x64f   : > { %v1771_v5 = vpop.f32.mrb[2].mxu0  ;;  %v1844_v6 = vpop.f32.mrb[8].mxu1 }
 0x650   : > { %v3010_v7 = vpop.f32.mrb[3].mxu0  ;;  %v3015_v8 = vpop.f32.mrb[9].mxu1 }
 0x651   : > { %v2261_v7 = vld [vmem:[%s3716_s26] sm:$0xff]  ;;  %v2262_v8 = vld [vmem:[%s3716_s26 + $0x8] sm:$0xff] }
 0x653   : > { %v1917_v9 = vpop.f32.mrb[4].mxu0  ;;  %v1990_v10 = vpop.f32.mrb[10].mxu1 }
 0x654   : > { %v1994_v12 = vcombine.low %v1771_v5, %v1917_v9  ;;  %v1995_v13 = vcombine.high %v1771_v5, %v1917_v9  ;;  %v2010_v15 = vcombine.low %v1844_v6, %v1990_v10  ;;  %v2011_v16 = vcombine.high %v1844_v6, %v1990_v10  ;;  %v3020_v17 = vpop.f32.mrb[5].mxu0  ;;  %v3025_v18 = vpop.f32.mrb[11].mxu1  ;;  %v2263_v9 = vld [vmem:[%s3716_s26 + $0x10] sm:$0xff]  ;;  %v2264_v10 = vld [vmem:[%s3716_s26 + $0x18] sm:$0xff] }
 0x655   : > { %v2349_v18 = vld [vmem:[%s3726_s6 + $0x18] sm:$0xff] }
 0x656   : > { %v2002_v19 = vrot.slane %v1994_v12, %v3798_v56  ;;  %v2009_v20 = vrot.slane %v1995_v13, %v3798_v56  ;;  %v2018_v28 = vrot.slane %v2010_v15, %v3798_v56  ;;  %v2025_v21 = vrot.slane %v2011_v16, %v3798_v56  ;;  %v2346_v13 = vld [vmem:[%s3726_s6] sm:$0xff]  ;;  %v2347_v15 = vld [vmem:[%s3726_s6 + $0x8] sm:$0xff]  ;;  %v2348_v16 = vld [vmem:[%s3726_s6 + $0x10] sm:$0xff] }
 0x657   : > { %v3117_v12 = vpack.c.bf16 %v2264_v10, %v2263_v9  ;;  %v3120_v17 = vpack.c.bf16 %v2347_v15, %v2346_v13 }
 0x658   : > { %v2026_v29 = vcombine.low %v2002_v19, %v2018_v28  ;;  %v2027_v22 = vcombine.high %v2002_v19, %v2018_v28  ;;  %v2042_v23 = vcombine.low %v2009_v20, %v2025_v21  ;;  %v2043_v24 = vcombine.high %v2009_v20, %v2025_v21  ;;  %v2350_v20 = vld [vmem:[%s3726_s6 + $0x20] sm:$0xff]  ;;  %v2351_v28 = vld [vmem:[%s3726_s6 + $0x28] sm:$0xff] }
 0x659   : > { %3121 = vmatpush3.bf16.msra.mxu0 %v3120_v17  ;;  %v3123_v19 = vpack.c.bf16 %v2349_v18, %v2348_v16  ;;  %v3126_v21 = vpack.c.bf16 %v2351_v28, %v2350_v20 }
 0x65a   : > { %v2034_v32 = vrot.slane %v2026_v29, %v3809_v2  ;;  %v2041_v33 = vrot.slane %v2027_v22, %v3809_v2  ;;  %v2050_v34 = vrot.slane %v2042_v23, %v3809_v2  ;;  %v2057_v36 = vrot.slane %v2043_v24, %v3809_v2  ;;  %3122 = vmatprep.subr.bf16.mxu0 %v3445_v11  ;;  %v2352_v29 = vld [vmem:[%s3726_s6 + $0x30] sm:$0xff]  ;;  %v2353_v22 = vld [vmem:[%s3726_s6 + $0x38] sm:$0xff]  ;;  %v2354_v24 = vld [vmem:[%s3726_s6 + $0x40] sm:$0xff] }
 0x65b   : > { %v3129_v23 = vpack.c.bf16 %v2353_v22, %v2352_v29  ;;  %v3132_v31 = vpack.c.bf16 %v2355_v26, %v2354_v24 }
 0x65c   : > { %v2062_v38 = vcombine.low %v2034_v32, %v2041_v33  ;;  %v2896_v39 = vcombine.high %v2034_v32, %v2041_v33  ;;  %v2078_v40 = vcombine.low %v2050_v34, %v2057_v36  ;;  %v2897_v41 = vcombine.high %v2050_v34, %v2057_v36  ;;  %v2356_v32 = vld [vmem:[%s3726_s6 + $0x50] sm:$0xff]  ;;  %v2357_v33 = vld [vmem:[%s3726_s6 + $0x58] sm:$0xff]  ;;  %v2358_v36 = vld [vmem:[%s3726_s6 + $0x60] sm:$0xff] }
 0x65d   : > { %3124 = vmatpush3.bf16.msra.mxu0 %v3123_v19  ;;  %v3135_v34 = vpack.c.bf16 %v2357_v33, %v2356_v32 }
 0x65e   : > { %v2069_v30 = vrot.slane %v2062_v38, %v3798_v56  ;;  %v2077_v35 = vrot.slane %v2896_v39, %v3798_v56  ;;  %v2085_v42 = vrot.slane %v2078_v40, %v3798_v56  ;;  %v2093_v43 = vrot.slane %v2897_v41, %v3798_v56  ;;  %3125 = vmatprep.subr.bf16.mxu0 %v3445_v11 }
 0x65f   : > { %v3138_v38 = vpack.c.bf16 %v2359_v37, %v2358_v36 }
 0x660   : > { %v2095_v44 = vcombine.high %v2069_v30, %v2077_v35  ;;  %v2111_v45 = vcombine.high %v2085_v42, %v2093_v43  ;;  %v2094_v46 = vcombine.low %v2069_v30, %v2077_v35  ;;  %v2110_v47 = vcombine.low %v2085_v42, %v2093_v43  ;;  %v2900_v35 = vld [vmem:[%s4222_s23] ss:$0 sm:$0xff]  ;;  %s4226_s23 = sld [smem:[#allocation34_spill]] (!%p2905_p8) }
 0x661   : > { %3127 = vmatpush3.bf16.msra.mxu0 %v3126_v21  ;;  %v2901_v43 = vld [vmem:[%s4223_s16] ss:$0 sm:$0xff] }
 0x662   : > { %v2109_v48 = vrot.slane %v2095_v44, %v3809_v2  ;;  %v2125_v49 = vrot.slane %v2111_v45, %v3809_v2  ;;  %v2102_v50 = vrot.slane %v2094_v46, %v3809_v2  ;;  %v2118_v51 = vrot.slane %v2110_v47, %v3809_v2  ;;  %3128 = vmatprep.subr.bf16.mxu0 %v3445_v11  ;;  %v2360_v45 = vld [vmem:[%s3726_s6 + $0x70] sm:$0xff]  ;;  %v2361_v46 = vld [vmem:[%s3726_s6 + $0x78] sm:$0xff] }
 0x663   : > { %v3141_v47 = vpack.c.bf16 %v2361_v46, %v2360_v45 }
 0x664   : > { %v2128_v52 = vcombine.low %v2109_v48, %v2125_v49  ;;  %v2127_v53 = vcombine.high %v2102_v50, %v2118_v51  ;;  %v2129_v54 = vcombine.high %v2109_v48, %v2125_v49  ;;  %v2126_v55 = vcombine.low %v2102_v50, %v2118_v51  ;;  %v2902_v48 = vld [vmem:[%s710_s4] ss:$0 sm:$0xff] }
 0x665   : > { %3130 = vmatpush3.bf16.msra.mxu0 %v3129_v23 }
 0x666   : > { %2135 = vrot.lane.b32.xlu0 %v2128_v52, %s3457_s28  ;;  %2131 = vrot.lane.b32.xlu1 %v2127_v53, %s4175_s18  ;;  %v2904_v53 = vld [vmem:[%s718_s29] ss:$0 sm:$0xff]  ;;  %s4227_s16 = smov (!%p2905_p8), %s4226_s23 }
 0x667   : > { %3131 = vmatprep.subr.bf16.mxu0 %v3445_v11 }
 0x669   : > { %3133 = vmatpush3.bf16.msra.mxu0 %v3132_v31 }
 0x66a   : > { %2139 = vrot.lane.b32.xlu1 %v2129_v54, %s3459_s5  ;;  %3134 = vmatprep.subr.bf16.mxu0 %v3445_v11  ;;  %s4225_s5 = sld [smem:[#allocation33_spill]] (!%p2905_p8) }
 0x66d   : > { %3136 = vmatpush3.bf16.msra.mxu0 %v3135_v34 }
 0x66e   : > { %3137 = vmatprep.subr.bf16.mxu0 %v3445_v11 }
 0x671   : > { %3139 = vmatpush3.bf16.msra.mxu0 %v3138_v38 }
 0x672   : > { %3140 = vmatprep.subr.bf16.mxu0 %v3445_v11 }
 0x675   : > { %3142 = vmatpush3.bf16.msra.mxu0 %v3141_v47 }
 0x6d8   : > { %v2132_v56 = vpop.permute.xlu1 %2131  ;;  %v2136_v57 = vpop.permute.xlu0 %2135 }
 0x6d9   : > { %v2142_v58 = vsel %vm1349_vm3, %v2126_v55, %v2132_v56 }
 0x6da   : > { %v2144_v2 = vsel %vm2143_vm4, %v2142_v58, %v2136_v57  ;;  %v2454_v58 = vld [vmem:[%s4225_s5] sm:$0xff] (!%p2905_p8) }
 0x6dc   : > { %v2140_v59 = vpop.permute.xlu1 %2139 }
 0x6dd   : > { %v2146_v60 = vsel %vm2145_vm5, %v2144_v2, %v2140_v59  ;;  %v2455_v59 = vld [vmem:[%s4225_s5 + $0x8] sm:$0xff] (!%p2905_p8)  ;;  %v2456_v2 = vld [vmem:[%s4225_s5 + $0x10] sm:$0xff] (!%p2905_p8) }
 0x6de   : > { %3035 = vmatmul.mubr.msk.f32.vlgmr.msra.gmra.mrb[12].mxu1 %vm729_vm1, %v2146_v60  ;;  %v3460_v60 = vmov (!%p2905_p8), 0.0|0.0  }
 0x6df   : > { %3045 = vmatprep.mubr.msk.f32.mxu1 %vm3446_vm2, %v3447_v14  ;;  %3143 = vmatprep.subr.bf16.mxu0 (!%p2905_p8), %v3460_v60 }
 0x7b1   : > { %v2227_v62 = vpop.f32.mrb[12].mxu1 }
 0x7b2   : > { %v2228_v63 = vadd.f32 %v2898_v61, %v2227_v62  ;;  %v3036_v0 = vpop.f32.mrb[13].mxu1  ;;  %v3144_v61 = vpack.c.bf16 (!%p2905_p8), %v2455_v59, %v2454_v58  ;;  %v2457_v62 = vld [vmem:[%s4225_s5 + $0x18] sm:$0xff] (!%p2905_p8) }
 0x7b4   : > { %v3951_v27 = vadd.f32 %v2228_v63, %v3739_v1  ;;  %v3114_v1 = vpack.c.bf16 %v2262_v8, %v2261_v7  ;;  %v3462_v63 = vmov (!%p2905_p8), 0.0   ;;  %v2532_v8 = vld [vmem:[%s4226_s23] sm:$0xff] (!%p2905_p8) }
 0x7b6   : > { %v2234_v3 = vsel %vm729_vm1, %v3951_v27, 0.0  ;;  %3115 = vmatpush3.bf16.msra.mxu1 %v3114_v1  ;;  %v2533_v1 = vld [vmem:[%s4227_s16 + $0x8] sm:$0xff] (!%p2905_p8) }
 0x7b7   : > { %2235 = vadd.xlane.f32.xlu0 %v2234_v3  ;;  %3116 = vmatprep.subr.bf16.mxu1 %v3445_v11  ;;  %v3147_v3 = vpack.c.bf16 (!%p2905_p8), %v2457_v62, %v2456_v2  ;;  %v3150_v9 = vpack.c.bf16 (!%p2905_p8), %v2533_v1, %v2532_v8 }
 0x7ba   : > { %3118 = vmatpush3.bf16.msra.mxu1 %v3117_v12 }
 0x7bb   : > { %3149 = vmatprep.subr.bf16.mxu1 (!%p2905_p8), %v3460_v60 }
 0x844   : > { %v2236_v25 = vpop.xlane.xlu0 %2235 }
 0x845   : > { %v2237_v14 = vmul.f32 0.03125, %v2236_v25 }
 0x847   : > { %v2238_v4 = vsub.f32 %v3951_v27, %v2237_v14 }
 0x849   : > { %v2239_v5 = vmul.f32 %v2238_v4, %v2238_v4 }
 0x84b   : > { %v2240_v6 = vsel %vm729_vm1, %v2239_v5, 0.0 }
 0x84c   : > { %2241 = vadd.xlane.f32.xlu1 %v2240_v6 }
 0x8d9   : > { %v2242_v39 = vpop.xlane.xlu1 %2241 }
 0x8da   : > { %v2243_v40 = vmul.f32 0.03125, %v2242_v39 }
 0x8dc   : > { %v2244_v41 = vadd.f32 1e-05, %v2243_v40 }
 0x8de   : > { %3291 = vrsqrt.f32 %v2244_v41 }
 0x8e8   : > { %v3292_v30 = vpop.eup %3291 }
 0x8e9   : > { %v2246_v42 = vmul.f32 %v3292_v30, %v2238_v4 }
 0x8eb   : > { %v2253_v44 = vmul.f32 %v2900_v35, %v2246_v42 }
 0x8ed   : > { %v2260_v11 = vadd.f32 %v2901_v43, %v2253_v44 }
 0x8ef   : > { %3046 = vmatmul.mubr.msk.f32.vlgmr.msra.gmra.mrb[14].mxu1 %vm729_vm1, %v2260_v11 }
 0x8f0   : > { %3098 = vmatprep.mubr.msk.f32.mxu1 (!%p2905_p8), %vm3461_vm6, %v3462_v63  ;;  %3151 = vmatpush3.bf16.msra.mxu1 (!%p2905_p8), %v3150_v9 }
 0x9c2   : > { %v2341_v49 = vpop.f32.mrb[14].mxu1 }
 0x9c3   : > { %v2342_v50 = vadd.f32 %v2902_v48, %v2341_v49  ;;  %v3047_v51 = vpop.f32.mrb[15].mxu1 }
 0x9c5   : > { %v2345_v52 = vmax.f32 %v2342_v50, 0.0 }
 0x9c7   : > { %3081 = vmatmul.mubr.f32.vlgmr.msra.gmra.mrb[6].mxu0 %v2345_v52 }
 0x9c8   : > { %3091 = vmatprep.mubr.msk.f32.mxu0 (!%p2905_p8), %vm3461_vm6, %v3462_v63  ;;  %3145 = vmatpush3.bf16.msra.mxu0 (!%p2905_p8), %v3144_v61 }
 0x9c9   : > { %3146 = vmatprep.subr.bf16.mxu0 (!%p2905_p8), %v3460_v60 }
 0x9cc   : > { %3148 = vmatpush3.bf16.msra.mxu0 (!%p2905_p8), %v3147_v3 }
 0xa99   : > { %2444 = sbr.rel (%p2905_p8) target bundleno = 3161 (0xc59), region = 88 }
 0xa9a   : > { %v2435_v54 = vpop.f32.mrb[6].mxu0 }
 0xa9b   : > { %v2436_v55 = vadd.f32 %v2904_v53, %v2435_v54  ;;  %v3082_v56 = vpop.f32.mrb[7].mxu0 }
 0xa9d   : > { %v2439_v57 = vadd.f32 %v2436_v55, %v3951_v27 }
 0xa9f   : > { %2440 = vst.msk [vmem:[#allocation2] sm:$0xff] %vm729_vm1, %v2439_v57  ;;  %v2445_v0 = vsel (!%p2905_p8), %vm729_vm1, %v2439_v57, 0.0 }
 0xaa0   : > { %v2446_v27 = vrot.slane %v2445_v0, 4 }
 0xaa2   : > { %v2447_v25 = vadd.f32 %v2446_v27, %v2445_v0 }
 0xaa4   : > { %v2448_v14 = vrot.slane %v2447_v25, 2 }
 0xaa6   : > { %v2449_v4 = vadd.f32 %v2448_v14, %v2447_v25 }
 0xaa8   : > { %v2450_v5 = vrot.slane %v2449_v4, 1 }
 0xaaa   : > { %v2451_v6 = vadd.f32 %v2450_v5, %v2449_v4 }
 0xaac   : > { %v2453_v7 = vmul.f32 0.125, %v2451_v6 }
 0xaae   : > { %3092 = vmatmul.mubr.msk.f32.vlgmr.msra.gmra.mrb[0].mxu0 %vm729_vm1, %v2453_v7 }
 0xb81   : > { %v2527_v10 = vpop.f32.mrb[0].mxu0 }
 0xb82   : > { %v2531_v12 = vmax.f32 %v2527_v10, 0.0  ;;  %v3093_v13 = vpop.f32.mrb[1].mxu0 }
 0xb84   : > { %3099 = vmatmul.mubr.msk.f32.vlgmr.msra.gmra.mrb[0].mxu1 %vm2143_vm4, %v2531_v12 }
 0xc57   : > { %v2603_v15 = vpop.f32.mrb[0].mxu1 }
 0xc58   : > { %2608 = vst.msk [vmem:[%s3734_s11] sm:$0x1] %vm2607_vm7, %v2603_v15  ;;  %v3100_v16 = vpop.f32.mrb[1].mxu1 }
 0xc59 PF: > { %s4228_s20 = sld [smem:[#allocation14_spill]]  ;;  %s4230_s4 = sld [smem:[#allocation35_spill]] }
 0xc5a   : > { %s2627_s14 = sshll.u32 %s3734_s11, 4  ;;  %s4231_s21 = sand.u32 1, %s3419_s25   ;;  %s2628_s14 = int_to_ptr.vmem [resolvable:$true] %s2627_s14 }
 0xc5b   : > { %s2610_s24 = scalar_lea.sflag [#allocation4], %s4231_s21  ;;  %s3293_s29 = scalar_lea.vmem %s2628_s14, 16 }
 0xc5c   : > { %p3294_p9 = scmp.ne.s32.totalorder %s2628_s14, %s3293_s29  ;;  %s3463_s15 = smov [#allocation3]  }
 0xc5d   : > { %s3297_s1 = sshll.u32 %s3463_s15, 4  ;;  %s3298_s1 = int_to_ptr.vmem [resolvable:$false] %s3297_s1 }
 0xc5e   : > { %p3295_p10 = pnand %p3294_p9, %p3622_p3  ;;  %s3299_s26 = scalar_lea.vmem %s3298_s1, 32 }
 0xc5f   : > { %s2909_s19 = sshll.u32 %s4228_s20, 4  ;;  %p3300_p0 = scmp.lt.s32.totalorder %s2628_s14, %s3298_s1 }
 0xc60   : > { %s4035_s6 = scalar_lea.hbm %s4230_s4, %s2909_s19  ;;  %p3296_p11 = pneg %p3295_p10 }
 0xc61   : > { %p3301_p1 = scmp.lt.s32.totalorder %s3299_s26, %s3293_s29 }
 0xc63   : > { %p3302_p4 = por %p3301_p1, %p3300_p0 }
 0xc65   : > { %p3303_p2 = pnand %p3302_p4, %p3296_p11 }
 0xc67   : > { %3306 = shalt.err (!%p3303_p2)
}
 0xc68   : > { %s3307_s11 = scalar_lea.hbm %s4035_s6, 16  ;;  %s3311_s0 = scalar_lea.hbm %s4230_s4, 32 }
 0xc69   : > { %p3308_p5 = scmp.ne.s32.totalorder %s4035_s6, %s3307_s11  ;;  %p3312_p9 = scmp.lt.u32.totalorder %s4035_s6, %s4230_s4 }
 0xc6a   : > { %p3313_p10 = scmp.lt.u32.totalorder %s3311_s0, %s3307_s11  ;;  %p3315_p0 = scmp.lt.u32.totalorder %s3307_s11, %s4035_s6 }
 0xc6b   : > { %p3309_p6 = pnand %p3308_p5, %p3622_p3 }
 0xc6c   : > { %p3314_p11 = por %p3313_p10, %p3312_p9 }
 0xc6d   : > { %p3310_p8 = pneg %p3309_p6 }
 0xc6e   : > { %p3316_p1 = por %p3315_p0, %p3314_p11 }
 0xc70   : > { %p3317_p4 = pnand %p3316_p1, %p3310_p8 }
 0xc72   : > { %3320 = shalt.err (!%p3317_p4)
}
 0xc73   : > { %s4232_s17 = sld [smem:[#allocation10_spill]]  ;;  %s2910_s21 = sshll.u32 %s4228_s20, 2 }
 0xc74   : > { %3152 = dma.vmem_to_hbm [thread:$0]  (%p3622_p3), %s2628_s14, 16, %s4035_s6, %s2610_s24  }
 0xc75   : > { %s2911_s29 = sshll.u32 %s3427_s27, 3  ;;  %s2642_s1 = sshll.u32 %s3736_s12, 4  ;;  %s4060_s1 = int_to_ptr.vmem [resolvable:$true] %s2642_s1 }
 0xc76   : > { %s2639_s15 = sadd.s32 %s2911_s29, %s2910_s21  ;;  %s4234_s23 = sld [smem:[#allocation36_spill]] }
 0xc77   : > { %s2912_s26 = sshll.u32 %s2639_s15, 7  ;;  %s3321_s18 = scalar_lea.vmem %s4060_s1, 512 }
 0xc78   : > { %p3322_p3 = scmp.ne.s32.totalorder %s4060_s1, %s3321_s18  ;;  %s3464_s27 = smov [#allocation5]  }
 0xc79   : > { %s4236_s0 = sand.u32 1, %s4232_s17   ;;  %s3325_s12 = sshll.u32 %s3464_s27, 4  ;;  %s3326_s12 = int_to_ptr.vmem [resolvable:$false] %s3325_s12 }
 0xc7a   : > { %s4069_s22 = scalar_lea.sflag [#allocation6], %s4236_s0  ;;  %p3323_p2 = pnand %p3322_p3, %p3651_p12 }
 0xc7b   : > { %s3327_s20 = scalar_lea.vmem %s3326_s12, 1024  ;;  %p3328_p6 = scmp.lt.s32.totalorder %s4060_s1, %s3326_s12 }
 0xc7c   : > { %s4235_s19 = smov %s4234_s23  ;;  %s4065_s13 = scalar_lea.hbm %s4234_s23, %s2912_s26 }
 0xc7d   : > { %p3324_p5 = pneg %p3323_p2  ;;  %p3329_p8 = scmp.lt.s32.totalorder %s3327_s20, %s3321_s18 }
 0xc7f   : > { %p3330_p9 = por %p3329_p8, %p3328_p6 }
 0xc81   : > { %p3331_p10 = pnand %p3330_p9, %p3324_p5 }
 0xc83   : > { %3334 = shalt.err (!%p3331_p10)
}
 0xc84   : > { %s3335_s6 = scalar_lea.hbm %s4065_s13, 512  ;;  %s3339_s17 = scalar_lea.hbm %s4235_s19, 2048 }
 0xc85   : > { %p3336_p11 = scmp.ne.s32.totalorder %s4065_s13, %s3335_s6  ;;  %p3340_p4 = scmp.lt.u32.totalorder %s4065_s13, %s4235_s19 }
 0xc86   : > { %p3341_p3 = scmp.lt.u32.totalorder %s3339_s17, %s3335_s6  ;;  %p3343_p5 = scmp.lt.u32.totalorder %s3335_s6, %s4065_s13 }
 0xc87   : > { %p3337_p0 = pnand %p3336_p11, %p3651_p12 }
 0xc88   : > { %p3342_p2 = por %p3341_p3, %p3340_p4 }
 0xc89   : > { %p3338_p1 = pneg %p3337_p0 }
 0xc8a   : > { %p3344_p6 = por %p3343_p5, %p3342_p2 }
 0xc8c   : > { %p3345_p8 = pnand %p3344_p6, %p3338_p1 }
 0xc8e   : > { %3348 = shalt.err (!%p3345_p8)
}
 0xc8f   : > { %s3465_s18 = smov 128   ;;  %s4237_s15 = smov 8  }
 0xc90   : > { %3153 = dma.vmem_to_hbm [thread:$0]  (%p3651_p12), %s4060_s1, 512, %s4065_s13, %s4069_s22, %s3465_s18, %s3465_s18, %s4237_s15  }
 0xc91 PF: > { %s4238_s26 = sld [smem:[#allocation17_spill]]  ;;  %s4239_s11 = sld [smem:[#allocation12_spill]] }
 0xc97   : > { %p3163_p9 = scmp.ge.s32.totalorder %s4238_s26, 2  ;;  %s2657_s23 = sand.u32 1, %s4239_s11  }
 0xc98   : > { %s2658_s0 = scalar_lea.sflag [#allocation4], %s2657_s23 }
 0xc99   : > { %p3157_p10 = pnand %p3163_p9, %p3639_p7 }
 0xc9b   : > { %3394 = dma.done.wait (!%p3157_p10), %s2658_s0, 16  }
 0xc9c   : > { %3396 = vsyncadd (!%p3157_p10), %s2658_s0, 4294967280  ;;  %s4241_s27 = sld [smem:[#allocation9_spill]]  ;;  %p3160_p11 = pnand %p3163_p9, %p3663_p13 }
 0xca2   : > { %s2665_s20 = sand.u32 1, %s4241_s27  }
 0xca3   : > { %s2666_s28 = scalar_lea.sflag [#allocation6], %s2665_s20 }
 0xca4   : > { %3398 = dma.done.wait (!%p3160_p11), %s2666_s28, 512  }
 0xca5   : > { %3400 = vsyncadd (!%p3160_p11), %s2666_s28, 4294966784  ;;  %s33_s0 = sadd.s32 1, %s4238_s26   ;;  %s4243_s21 = sld [smem:[#allocation10_spill]] }
 0xca6   : > { %p30_p12 = scmp.ge.s32.totalorder %s33_s0, 6   ;;  %s4244_s22 = sld [smem:[#allocation11_spill]] }
 0xca7   : > { %s4245_s23 = sld [smem:[#allocation24_spill]]  ;;  %s4246_s1 = sld [smem:[#allocation13_spill]] }
 0xca8   : > { %s4247_s26 = sld [smem:[#allocation23_spill]]  ;;  %s4248_s27 = sld [smem:[#allocation15_spill]] }
 0xca9   : > { %s4249_s28 = sld [smem:[#allocation16_spill]]  ;;  %s4250_s29 = sld [smem:[#allocation18_spill]] }
 0xcaa   : > { %s4251_s30 = sld [smem:[#allocation20_spill]]  ;;  %s4252_s24 = smov %s3419_s25 }
 0xcab   :  { %32 = sbr.rel (!%p30_p12) target bundleno = 21 (0x15), region = 173 }
 0xcad   : > { %s4253_s25 = smov %s4246_s1 }
 0xcb2   :  { %2671 = vsyncpa [#allocation4], 1 }
 0xcb3   :  { %2673 = vsyncpa [#allocation4 + $0x1], 1 }
 0xcb4   :  { %2674 = vsyncpa [#allocation6], 1 }
 0xcb5   :  { %2676 = vsyncpa [#allocation6 + $0x1], 1 }

</bundles_post_ra>
